<compile_context>
chip_gen: v7x
topology: tpu7x:2x2x1
jax: 0.10.0
libtpu: 0.0.40
codegen_flags: <defaults>
</compile_context>

<pallas_src>
import jax
import jax.numpy as jnp
from jax.experimental import pallas as pl

# ----------------------------- dimensions ------------------------------------
T, B = 8, 2
TB = T * B
OBS_DIM, ACT_DIM, STATE_DIM = 16, 6, 10
OBS_EMB, ACT_EMB, REW_EMB = 32, 16, 16
RNN_IN = OBS_EMB + ACT_EMB + REW_EMB      # 64
HID = 32                                  # seq_model hidden size
SHORTCUT = RNN_IN                         # continuous action, no image encoder
CURR_EMB = 2 * SHORTCUT                   # 128
Q_IN = HID + CURR_EMB                     # 160
Q_HID = 64
RECON_HID = 64
RECON_LOSS_W = 1.0

# concatenated kernel input x = [a(6) | r(1) | o(16) | ca(6) | pad(3)]
X_DIM = ACT_DIM + 1 + OBS_DIM + ACT_DIM   # 29
X_PADDED = 32

# fused-embedder output lane layout:
#   lanes   0:128 -> curr_embed = [eco(64) | eca(64)]
#   lanes 128:192 -> rnn_in     = [ea(16) | er(16) | eo(32)]
#   lanes 192:256 -> zero
SLAB_COLS = 256
OUT_COLS = 128                            # lane 0 = q1, lane 1 = q2, 2:12 recon

# weight-slab row offsets (all multiples of 8)
R_EMB = 0       # (32, 256)  fused embedder weights
R_WI = 32       # (128, 96)  GRU input-gate weights, K padded to 128
R_WH = 160      # (32, 96)   GRU hidden-gate weights
R_W1H = 192     # (32, 192)  hs -> [qf1 h1 | qf2 h1 | recon hidden]
R_W1C = 224     # (128, 128) curr_embed -> [qf1 h1 | qf2 h1]
R_W2 = 352      # (128, 128) blkdiag(qf1 layer2, qf2 layer2)
R_W3 = 480      # (128, 128) critic heads -> output lanes 0,1
R_RW2 = 608     # (128, 128) recon layer2 -> output lanes 2:12
R_BEMB = 736
R_BI = 744      # input-gate bias with bh_r / bh_z folded in
R_BHN = 752     # remaining n-gate hidden bias
R_B1 = 760
R_B2 = 768
R_BOUT = 776
SLAB_ROWS = 784


# ----------------------------- fused Pallas kernel ----------------------------
def _critic_fused_kernel(x_ref, w_ref, out_ref):
    f32 = jnp.float32
    relu = lambda v: jnp.maximum(v, 0.0)
    dot = lambda a, b: jnp.dot(a, b, preferred_element_type=f32)

    x = x_ref[...]                                         # (TB, 32)

    # --- all five embedders in one block-structured GEMM ---
    emb = relu(dot(x, w_ref[R_EMB:R_EMB + 32, :])
               + w_ref[R_BEMB:R_BEMB + 1, :])              # (TB, 256)
    curr = emb[:, 0:128]                                   # [eco | eca], free slice
    rnn_x = emb[:, 128:256]                                # [ea|er|eo|0], free slice

    # --- x-side GRU gates for all T*B rows (bh_r, bh_z folded into bias) ---
    gx = (dot(rnn_x, w_ref[R_WI:R_WI + 128, 0:128])
          + w_ref[R_BI:R_BI + 1, 0:128])                   # (TB, 128), cols 96: zero

    wh = w_ref[R_WH:R_WH + 32, 0:128]                      # (HID, 128)
    bhn = jnp.broadcast_to(w_ref[R_BHN:R_BHN + 1, 0:128], (B, 128))  # hoisted once

    # --- GRU recurrence, fully unrolled over T (zero initial state) ---
    h = jnp.zeros((B, HID), f32)
    hs_steps = []
    for t in range(T):
        gx_t = gx[t * B:(t + 1) * B, :]                    # (B, 128) static slice
        gh = dot(h, wh) + bhn                              # (B, 128)
        r_g = jax.nn.sigmoid(gx_t[:, 0:HID] + gh[:, 0:HID])
        z_g = jax.nn.sigmoid(gx_t[:, HID:2 * HID] + gh[:, HID:2 * HID])
        n_g = jnp.tanh(gx_t[:, 2 * HID:3 * HID] + r_g * gh[:, 2 * HID:3 * HID])
        h = (1.0 - z_g) * n_g + z_g * h
        hs_steps.append(h)
    hs = jnp.concatenate(hs_steps, axis=0)                 # (TB, HID), one assemble

    # --- critic layer 1 (both critics) + recon layer 1, fused ---
    # lanes: [qf1 h1 (64) | qf2 h1 (64) | recon hidden (64) | zero (64)]
    pre1 = (dot(hs, w_ref[R_W1H:R_W1H + 32, :])
            + dot(curr, w_ref[R_W1C:R_W1C + 128, :])
            + w_ref[R_B1:R_B1 + 1, :])                     # (TB, 256)
    h1rh = relu(pre1)
    h1 = h1rh[:, 0:128]                                    # twin-critic hidden 1
    rh = h1rh[:, 128:256]                                  # recon hidden (+ zeros)

    # --- critic layer 2 (block-diagonal over the twin critics) ---
    h2 = relu(dot(h1, w_ref[R_W2:R_W2 + 128, 0:128])
              + w_ref[R_B2:R_B2 + 1, 0:128])               # (TB, 128)

    # --- critic heads + recon layer 2 summed into one lane-dense output ---
    out_ref[...] = (dot(h2, w_ref[R_W3:R_W3 + 128, 0:128])
                    + dot(rh, w_ref[R_RW2:R_RW2 + 128, 0:128])
                    + w_ref[R_BOUT:R_BOUT + 1, 0:128])     # (TB, 128) full store


# ----------------------------- parameter init --------------------------------
def _linear(key, fan_in, fan_out):
    k1, k2 = jax.random.split(key)
    bound = 1.0 / jnp.sqrt(jnp.float32(fan_in))
    w = jax.random.uniform(k1, (fan_in, fan_out), jnp.float32, -bound, bound)
    b = jax.random.uniform(k2, (1, fan_out), jnp.float32, -bound, bound)
    return w, b


def init_params(key):
    ks = jax.random.split(key, 32)
    it = iter(ks)
    wa, ba = _linear(next(it), ACT_DIM, ACT_EMB)
    wr, br = _linear(next(it), 1, REW_EMB)
    wo, bo = _linear(next(it), OBS_DIM, OBS_EMB)
    wco, bco = _linear(next(it), OBS_DIM, SHORTCUT)
    wca, bca = _linear(next(it), ACT_DIM, SHORTCUT)
    embed = (wa, ba, wr, br, wo, bo, wco, bco, wca, bca)
    gru_ws, gru_bs = [], []
    for fan_in in (RNN_IN, RNN_IN, RNN_IN, HID, HID, HID):
        k1, k2 = jax.random.split(next(it))
        bound = 1.0 / jnp.sqrt(jnp.float32(HID))
        gru_ws.append(jax.random.uniform(k1, (fan_in, HID), jnp.float32, -bound, bound))
        gru_bs.append(jax.random.uniform(k2, (1, HID), jnp.float32, -bound, bound))
    gru = tuple(gru_ws) + tuple(gru_bs)

    def _qf(k):
        k1, k2, k3 = jax.random.split(k, 3)
        w1, b1 = _linear(k1, Q_IN, Q_HID)
        w2, b2 = _linear(k2, Q_HID, Q_HID)
        w3, b3 = _linear(k3, Q_HID, 1)
        return (w1, b1, w2, b2, w3, b3)

    qf1 = _qf(next(it))
    qf2 = _qf(next(it))
    rw1, rb1 = _linear(next(it), HID, RECON_HID)
    rw2, rb2 = _linear(next(it), RECON_HID, STATE_DIM)
    recon = (rw1, rb1, rw2, rb2)
    return dict(embed=embed, gru=gru, qf1=qf1, qf2=qf2, recon=recon)


def pack_params(params):
    """Pack every module weight/bias into one zero-padded (784, 256) f32 slab."""
    wa, ba, wr, br, wo, bo, wco, bco, wca, bca = params["embed"]
    wir, wiz, win, whr, whz, whn, bir, biz, bin_, bhr, bhz, bhn = params["gru"]
    q1w1, q1b1, q1w2, q1b2, q1w3, q1b3 = params["qf1"]
    q2w1, q2b1, q2w2, q2b2, q2w3, q2b3 = params["qf2"]
    rw1, rb1, rw2, rb2 = params["recon"]

    s = jnp.zeros((SLAB_ROWS, SLAB_COLS), jnp.float32)

    # fused embedder: x rows [a 0:6 | r 6:7 | o 7:23 | ca 23:29 | pad]
    s = s.at[R_EMB + 0:R_EMB + 6, 128:144].set(wa)            # ea
    s = s.at[R_EMB + 6:R_EMB + 7, 144:160].set(wr)            # er
    s = s.at[R_EMB + 7:R_EMB + 23, 160:192].set(wo)           # eo
    s = s.at[R_EMB + 7:R_EMB + 23, 0:64].set(wco)             # eco
    s = s.at[R_EMB + 23:R_EMB + 29, 64:128].set(wca)          # eca
    s = s.at[R_BEMB:R_BEMB + 1, 0:64].set(bco)
    s = s.at[R_BEMB:R_BEMB + 1, 64:128].set(bca)
    s = s.at[R_BEMB:R_BEMB + 1, 128:144].set(ba)
    s = s.at[R_BEMB:R_BEMB + 1, 144:160].set(br)
    s = s.at[R_BEMB:R_BEMB + 1, 160:192].set(bo)

    # GRU: gates packed [r | z | n]; K rows match emb lanes 128:256 (rows 64: zero)
    wi = jnp.concatenate([wir, wiz, win], axis=1)             # (64, 96)
    wh = jnp.concatenate([whr, whz, whn], axis=1)             # (32, 96)
    bi = jnp.concatenate([bir + bhr, biz + bhz, bin_], axis=1)  # bh_r/bh_z folded
    s = s.at[R_WI:R_WI + RNN_IN, 0:96].set(wi)
    s = s.at[R_WH:R_WH + HID, 0:96].set(wh)
    s = s.at[R_BI:R_BI + 1, 0:96].set(bi)
    s = s.at[R_BHN:R_BHN + 1, 64:96].set(bhn)                 # only n-gate bias left

    # critic layer 1 (both critics) + recon layer 1: joint = [hs(32) | curr(128)]
    s = s.at[R_W1H:R_W1H + HID, 0:64].set(q1w1[:HID])
    s = s.at[R_W1H:R_W1H + HID, 64:128].set(q2w1[:HID])
    s = s.at[R_W1H:R_W1H + HID, 128:192].set(rw1)
    s = s.at[R_W1C:R_W1C + CURR_EMB, 0:64].set(q1w1[HID:])
    s = s.at[R_W1C:R_W1C + CURR_EMB, 64:128].set(q2w1[HID:])
    s = s.at[R_B1:R_B1 + 1, 0:64].set(q1b1)
    s = s.at[R_B1:R_B1 + 1, 64:128].set(q2b1)
    s = s.at[R_B1:R_B1 + 1, 128:192].set(rb1)

    # critic layer 2, block-diagonal over the twin critics
    s = s.at[R_W2:R_W2 + Q_HID, 0:64].set(q1w2)
    s = s.at[R_W2 + Q_HID:R_W2 + 2 * Q_HID, 64:128].set(q2w2)
    s = s.at[R_B2:R_B2 + 1, 0:64].set(q1b2)
    s = s.at[R_B2:R_B2 + 1, 64:128].set(q2b2)

    # critic heads -> output lanes 0,1; recon layer 2 -> output lanes 2:12
    s = s.at[R_W3:R_W3 + Q_HID, 0:1].set(q1w3)
    s = s.at[R_W3 + Q_HID:R_W3 + 2 * Q_HID, 1:2].set(q2w3)
    s = s.at[R_RW2:R_RW2 + RECON_HID, 2:2 + STATE_DIM].set(rw2)
    s = s.at[R_BOUT:R_BOUT + 1, 0:1].set(q1b3)
    s = s.at[R_BOUT:R_BOUT + 1, 1:2].set(q2b3)
    s = s.at[R_BOUT:R_BOUT + 1, 2:2 + STATE_DIM].set(rb2)
    return s


# ----------------------------- forward wrapper --------------------------------
@jax.jit
def critic_rnn_forward(w_slab, prev_actions, rewards, observs, states,
                       current_actions):
    a2 = prev_actions.reshape(TB, ACT_DIM)
    r2 = rewards.reshape(TB, 1)
    o2 = observs.reshape(TB, OBS_DIM)
    ca2 = current_actions.reshape(TB, ACT_DIM)
    x_in = jnp.concatenate(
        [a2, r2, o2, ca2, jnp.zeros((TB, X_PADDED - X_DIM), jnp.float32)],
        axis=-1)                                            # (TB, 32)

    out = pl.pallas_call(
        _critic_fused_kernel,
        out_shape=jax.ShapeDtypeStruct((TB, OUT_COLS), jnp.float32),
    )(x_in, w_slab)

    q1 = out[:, 0:1].reshape(T, B, 1)
    q2 = out[:, 1:2].reshape(T, B, 1)
    recon_state = out[:, 2:2 + STATE_DIM].reshape(T, B, STATE_DIM)

    aux_info = {
        "recon_state": recon_state,
        "recon_target": states,            # recon_type == "recon_s": identity
        "recon_loss_w": RECON_LOSS_W,
        # TODO(synk): recon_loss_fcn is a Python callable handle in the torch
        # module's aux_info; it has no tensor value so it is omitted here.
    }
    return q1, q2, aux_info


# ----------------------------- pure-JAX reference ------------------------------
def _reference(params, prev_actions, rewards, observs, states, current_actions):
    wa, ba, wr, br, wo, bo, wco, bco, wca, bca = params["embed"]
    relu = lambda x: jnp.maximum(x, 0.0)
    ea = relu(prev_actions @ wa + ba)
    er = relu(rewards @ wr + br)
    eo = relu(observs @ wo + bo)
    rnn_in = jnp.concatenate([ea, er, eo], axis=-1)
    wir, wiz, win, whr, whz, whn, bir, biz, bin_, bhr, bhz, bhn = params["gru"]

    def step(h, x):
        r = jax.nn.sigmoid(x @ wir + bir + h @ whr + bhr)
        z = jax.nn.sigmoid(x @ wiz + biz + h @ whz + bhz)
        n = jnp.tanh(x @ win + bin_ + r * (h @ whn + bhn))
        h_new = (1.0 - z) * n + z * h
        return h_new, h_new

    _, hs = jax.lax.scan(step, jnp.zeros((B, HID), jnp.float32), rnn_in)
    curr = jnp.concatenate([relu(observs @ wco + bco),
                            relu(current_actions @ wca + bca)], axis=-1)
    joint = jnp.concatenate([hs, curr], axis=-1)

    def mlp3(p, x):
        w1, b1, w2, b2, w3, b3 = p
        return relu(relu(x @ w1 + b1) @ w2 + b2) @ w3 + b3

    rw1, rb1, rw2, rb2 = params["recon"]
    recon = relu(hs @ rw1 + rb1) @ rw2 + rb2
    return mlp3(params["qf1"], joint), mlp3(params["qf2"], joint), recon


# ----------------------------- main -------------------------------------------
if __name__ == "__main__":
    key = jax.random.PRNGKey(0)
    kp, ka, kr, ko, ks, kc = jax.random.split(key, 6)
    params = init_params(kp)
    w_slab = pack_params(params)

    prev_actions = jax.random.normal(ka, (T, B, ACT_DIM), jnp.float32)
    rewards = jax.random.normal(kr, (T, B, 1), jnp.float32)
    observs = jax.random.normal(ko, (T, B, OBS_DIM), jnp.float32)
    states = jax.random.normal(ks, (T, B, STATE_DIM), jnp.float32)
    current_actions = jax.random.normal(kc, (T, B, ACT_DIM), jnp.float32)

    q1, q2, aux = critic_rnn_forward(w_slab, prev_actions, rewards, observs,
                                     states, current_actions)
    jax.block_until_ready((q1, q2, aux["recon_state"]))

    # sanity check against a pure-JAX reference (tolerance covers default
    # TPU matmul precision in the reference path)
    q1_ref, q2_ref, recon_ref = _reference(params, prev_actions, rewards,
                                           observs, states, current_actions)
    assert q1.shape == (T, B, 1) and q2.shape == (T, B, 1)
    assert aux["recon_state"].shape == (T, B, STATE_DIM)
    assert jnp.allclose(q1, q1_ref, atol=1e-2, rtol=1e-2)
    assert jnp.allclose(q2, q2_ref, atol=1e-2, rtol=1e-2)
    assert jnp.allclose(aux["recon_state"], recon_ref, atol=1e-2, rtol=1e-2)
    assert jnp.allclose(aux["recon_target"], states)

    print("KERNEL_OK")
</pallas_src>

<mosaic_0001>
module attributes {stable_mosaic.version = 11 : i64} {
  func.func @_critic_fused_kernel(%arg0: memref<16x32xf32, #tpu.memory_space<vmem>>, %arg1: memref<784x256xf32, #tpu.memory_space<vmem>>, %arg2: memref<16x128xf32, #tpu.memory_space<vmem>>) attributes {dimension_semantics = [], scalar_prefetch = 0 : i64, scratch_operands = 0 : i64, tpu.core_type = #tpu.core_type<tc>} {
    %c0 = arith.constant 0 : index
    %c0_0 = arith.constant 0 : index
    %0 = vector.load %arg0[%c0, %c0_0] : memref<16x32xf32, #tpu.memory_space<vmem>>, vector<16x32xf32>
    %c0_1 = arith.constant 0 : index
    %c0_2 = arith.constant 0 : index
    %1 = vector.load %arg1[%c0_1, %c0_2] : memref<784x256xf32, #tpu.memory_space<vmem>>, vector<32x256xf32>
    %cst = arith.constant dense<0.000000e+00> : vector<16x256xf32>
    %2 = tpu.matmul %0, %1, %cst {dimension_numbers = #tpu.dot_dimension_numbers<[1], [0], [0], [1], [0, 0, 1, 1], [], []>} : vector<16x32xf32>, vector<32x256xf32>, vector<16x256xf32> -> vector<16x256xf32>
    %c736 = arith.constant 736 : index
    %c0_3 = arith.constant 0 : index
    %3 = vector.load %arg1[%c736, %c0_3] : memref<784x256xf32, #tpu.memory_space<vmem>>, vector<1x256xf32>
    %4 = vector.broadcast %3 : vector<1x256xf32> to vector<16x256xf32>
    %5 = arith.addf %2, %4 : vector<16x256xf32>
    %cst_4 = arith.constant 0.000000e+00 : f32
    %6 = vector.broadcast %cst_4 : f32 to vector<16x256xf32>
    %7 = arith.maximumf %5, %6 : vector<16x256xf32>
    %8 = vector.extract_strided_slice %7 {offsets = [0, 0], sizes = [16, 128], strides = [1, 1]} : vector<16x256xf32> to vector<16x128xf32>
    %9 = vector.extract_strided_slice %7 {offsets = [0, 128], sizes = [16, 128], strides = [1, 1]} : vector<16x256xf32> to vector<16x128xf32>
    %c32 = arith.constant 32 : index
    %c0_5 = arith.constant 0 : index
    %10 = vector.load %arg1[%c32, %c0_5] : memref<784x256xf32, #tpu.memory_space<vmem>>, vector<128x128xf32>
    %cst_6 = arith.constant dense<0.000000e+00> : vector<16x128xf32>
    %11 = tpu.matmul %9, %10, %cst_6 {dimension_numbers = #tpu.dot_dimension_numbers<[1], [0], [0], [1], [0, 0, 1, 1], [], []>} : vector<16x128xf32>, vector<128x128xf32>, vector<16x128xf32> -> vector<16x128xf32>
    %c744 = arith.constant 744 : index
    %c0_7 = arith.constant 0 : index
    %12 = vector.load %arg1[%c744, %c0_7] : memref<784x256xf32, #tpu.memory_space<vmem>>, vector<1x128xf32>
    %13 = vector.broadcast %12 : vector<1x128xf32> to vector<16x128xf32>
    %14 = arith.addf %11, %13 : vector<16x128xf32>
    %c160 = arith.constant 160 : index
    %c0_8 = arith.constant 0 : index
    %15 = vector.load %arg1[%c160, %c0_8] : memref<784x256xf32, #tpu.memory_space<vmem>>, vector<32x128xf32>
    %c752 = arith.constant 752 : index
    %c0_9 = arith.constant 0 : index
    %16 = vector.load %arg1[%c752, %c0_9] : memref<784x256xf32, #tpu.memory_space<vmem>>, vector<1x128xf32>
    %17 = vector.shape_cast %16 : vector<1x128xf32> to vector<1x128xf32>
    %18 = vector.broadcast %17 : vector<1x128xf32> to vector<2x128xf32>
    %cst_10 = arith.constant 0.000000e+00 : f32
    %19 = vector.broadcast %cst_10 : f32 to vector<2x32xf32>
    %20 = vector.extract_strided_slice %14 {offsets = [0, 0], sizes = [2, 128], strides = [1, 1]} : vector<16x128xf32> to vector<2x128xf32>
    %cst_11 = arith.constant dense<0.000000e+00> : vector<2x128xf32>
    %21 = tpu.matmul %19, %15, %cst_11 {dimension_numbers = #tpu.dot_dimension_numbers<[1], [0], [0], [1], [0, 0, 1, 1], [], []>} : vector<2x32xf32>, vector<32x128xf32>, vector<2x128xf32> -> vector<2x128xf32>
    %22 = arith.addf %21, %18 : vector<2x128xf32>
    %23 = vector.extract_strided_slice %20 {offsets = [0, 0], sizes = [2, 32], strides = [1, 1]} : vector<2x128xf32> to vector<2x32xf32>
    %24 = vector.extract_strided_slice %22 {offsets = [0, 0], sizes = [2, 32], strides = [1, 1]} : vector<2x128xf32> to vector<2x32xf32>
    %25 = arith.addf %23, %24 : vector<2x32xf32>
    %26 = arith.negf %25 : vector<2x32xf32>
    %27 = math.exp %26 : vector<2x32xf32>
    %cst_12 = arith.constant 1.000000e+00 : f32
    %28 = vector.broadcast %cst_12 : f32 to vector<2x32xf32>
    %29 = arith.addf %28, %27 : vector<2x32xf32>
    %30 = arith.divf %28, %29 : vector<2x32xf32>
    %31 = vector.extract_strided_slice %20 {offsets = [0, 32], sizes = [2, 32], strides = [1, 1]} : vector<2x128xf32> to vector<2x32xf32>
    %32 = vector.extract_strided_slice %22 {offsets = [0, 32], sizes = [2, 32], strides = [1, 1]} : vector<2x128xf32> to vector<2x32xf32>
    %33 = arith.addf %31, %32 : vector<2x32xf32>
    %34 = arith.negf %33 : vector<2x32xf32>
    %35 = math.exp %34 : vector<2x32xf32>
    %cst_13 = arith.constant 1.000000e+00 : f32
    %36 = vector.broadcast %cst_13 : f32 to vector<2x32xf32>
    %37 = arith.addf %36, %35 : vector<2x32xf32>
    %38 = arith.divf %36, %37 : vector<2x32xf32>
    %39 = vector.extract_strided_slice %20 {offsets = [0, 64], sizes = [2, 32], strides = [1, 1]} : vector<2x128xf32> to vector<2x32xf32>
    %40 = vector.extract_strided_slice %22 {offsets = [0, 64], sizes = [2, 32], strides = [1, 1]} : vector<2x128xf32> to vector<2x32xf32>
    %41 = arith.mulf %30, %40 : vector<2x32xf32>
    %42 = arith.addf %39, %41 : vector<2x32xf32>
    %43 = math.tanh %42 : vector<2x32xf32>
    %cst_14 = arith.constant 1.000000e+00 : f32
    %44 = vector.broadcast %cst_14 : f32 to vector<2x32xf32>
    %45 = arith.subf %44, %38 : vector<2x32xf32>
    %46 = arith.mulf %45, %43 : vector<2x32xf32>
    %47 = arith.mulf %38, %19 : vector<2x32xf32>
    %48 = arith.addf %46, %47 : vector<2x32xf32>
    %49 = vector.extract_strided_slice %14 {offsets = [2, 0], sizes = [2, 128], strides = [1, 1]} : vector<16x128xf32> to vector<2x128xf32>
    %cst_15 = arith.constant dense<0.000000e+00> : vector<2x128xf32>
    %50 = tpu.matmul %48, %15, %cst_15 {dimension_numbers = #tpu.dot_dimension_numbers<[1], [0], [0], [1], [0, 0, 1, 1], [], []>} : vector<2x32xf32>, vector<32x128xf32>, vector<2x128xf32> -> vector<2x128xf32>
    %51 = arith.addf %50, %18 : vector<2x128xf32>
    %52 = vector.extract_strided_slice %49 {offsets = [0, 0], sizes = [2, 32], strides = [1, 1]} : vector<2x128xf32> to vector<2x32xf32>
    %53 = vector.extract_strided_slice %51 {offsets = [0, 0], sizes = [2, 32], strides = [1, 1]} : vector<2x128xf32> to vector<2x32xf32>
    %54 = arith.addf %52, %53 : vector<2x32xf32>
    %55 = arith.negf %54 : vector<2x32xf32>
    %56 = math.exp %55 : vector<2x32xf32>
    %cst_16 = arith.constant 1.000000e+00 : f32
    %57 = vector.broadcast %cst_16 : f32 to vector<2x32xf32>
    %58 = arith.addf %57, %56 : vector<2x32xf32>
    %59 = arith.divf %57, %58 : vector<2x32xf32>
    %60 = vector.extract_strided_slice %49 {offsets = [0, 32], sizes = [2, 32], strides = [1, 1]} : vector<2x128xf32> to vector<2x32xf32>
    %61 = vector.extract_strided_slice %51 {offsets = [0, 32], sizes = [2, 32], strides = [1, 1]} : vector<2x128xf32> to vector<2x32xf32>
    %62 = arith.addf %60, %61 : vector<2x32xf32>
    %63 = arith.negf %62 : vector<2x32xf32>
    %64 = math.exp %63 : vector<2x32xf32>
    %cst_17 = arith.constant 1.000000e+00 : f32
    %65 = vector.broadcast %cst_17 : f32 to vector<2x32xf32>
    %66 = arith.addf %65, %64 : vector<2x32xf32>
    %67 = arith.divf %65, %66 : vector<2x32xf32>
    %68 = vector.extract_strided_slice %49 {offsets = [0, 64], sizes = [2, 32], strides = [1, 1]} : vector<2x128xf32> to vector<2x32xf32>
    %69 = vector.extract_strided_slice %51 {offsets = [0, 64], sizes = [2, 32], strides = [1, 1]} : vector<2x128xf32> to vector<2x32xf32>
    %70 = arith.mulf %59, %69 : vector<2x32xf32>
    %71 = arith.addf %68, %70 : vector<2x32xf32>
    %72 = math.tanh %71 : vector<2x32xf32>
    %cst_18 = arith.constant 1.000000e+00 : f32
    %73 = vector.broadcast %cst_18 : f32 to vector<2x32xf32>
    %74 = arith.subf %73, %67 : vector<2x32xf32>
    %75 = arith.mulf %74, %72 : vector<2x32xf32>
    %76 = arith.mulf %67, %48 : vector<2x32xf32>
    %77 = arith.addf %75, %76 : vector<2x32xf32>
    %78 = vector.extract_strided_slice %14 {offsets = [4, 0], sizes = [2, 128], strides = [1, 1]} : vector<16x128xf32> to vector<2x128xf32>
    %cst_19 = arith.constant dense<0.000000e+00> : vector<2x128xf32>
    %79 = tpu.matmul %77, %15, %cst_19 {dimension_numbers = #tpu.dot_dimension_numbers<[1], [0], [0], [1], [0, 0, 1, 1], [], []>} : vector<2x32xf32>, vector<32x128xf32>, vector<2x128xf32> -> vector<2x128xf32>
    %80 = arith.addf %79, %18 : vector<2x128xf32>
    %81 = vector.extract_strided_slice %78 {offsets = [0, 0], sizes = [2, 32], strides = [1, 1]} : vector<2x128xf32> to vector<2x32xf32>
    %82 = vector.extract_strided_slice %80 {offsets = [0, 0], sizes = [2, 32], strides = [1, 1]} : vector<2x128xf32> to vector<2x32xf32>
    %83 = arith.addf %81, %82 : vector<2x32xf32>
    %84 = arith.negf %83 : vector<2x32xf32>
    %85 = math.exp %84 : vector<2x32xf32>
    %cst_20 = arith.constant 1.000000e+00 : f32
    %86 = vector.broadcast %cst_20 : f32 to vector<2x32xf32>
    %87 = arith.addf %86, %85 : vector<2x32xf32>
    %88 = arith.divf %86, %87 : vector<2x32xf32>
    %89 = vector.extract_strided_slice %78 {offsets = [0, 32], sizes = [2, 32], strides = [1, 1]} : vector<2x128xf32> to vector<2x32xf32>
    %90 = vector.extract_strided_slice %80 {offsets = [0, 32], sizes = [2, 32], strides = [1, 1]} : vector<2x128xf32> to vector<2x32xf32>
    %91 = arith.addf %89, %90 : vector<2x32xf32>
    %92 = arith.negf %91 : vector<2x32xf32>
    %93 = math.exp %92 : vector<2x32xf32>
    %cst_21 = arith.constant 1.000000e+00 : f32
    %94 = vector.broadcast %cst_21 : f32 to vector<2x32xf32>
    %95 = arith.addf %94, %93 : vector<2x32xf32>
    %96 = arith.divf %94, %95 : vector<2x32xf32>
    %97 = vector.extract_strided_slice %78 {offsets = [0, 64], sizes = [2, 32], strides = [1, 1]} : vector<2x128xf32> to vector<2x32xf32>
    %98 = vector.extract_strided_slice %80 {offsets = [0, 64], sizes = [2, 32], strides = [1, 1]} : vector<2x128xf32> to vector<2x32xf32>
    %99 = arith.mulf %88, %98 : vector<2x32xf32>
    %100 = arith.addf %97, %99 : vector<2x32xf32>
    %101 = math.tanh %100 : vector<2x32xf32>
    %cst_22 = arith.constant 1.000000e+00 : f32
    %102 = vector.broadcast %cst_22 : f32 to vector<2x32xf32>
    %103 = arith.subf %102, %96 : vector<2x32xf32>
    %104 = arith.mulf %103, %101 : vector<2x32xf32>
    %105 = arith.mulf %96, %77 : vector<2x32xf32>
    %106 = arith.addf %104, %105 : vector<2x32xf32>
    %107 = vector.extract_strided_slice %14 {offsets = [6, 0], sizes = [2, 128], strides = [1, 1]} : vector<16x128xf32> to vector<2x128xf32>
    %cst_23 = arith.constant dense<0.000000e+00> : vector<2x128xf32>
    %108 = tpu.matmul %106, %15, %cst_23 {dimension_numbers = #tpu.dot_dimension_numbers<[1], [0], [0], [1], [0, 0, 1, 1], [], []>} : vector<2x32xf32>, vector<32x128xf32>, vector<2x128xf32> -> vector<2x128xf32>
    %109 = arith.addf %108, %18 : vector<2x128xf32>
    %110 = vector.extract_strided_slice %107 {offsets = [0, 0], sizes = [2, 32], strides = [1, 1]} : vector<2x128xf32> to vector<2x32xf32>
    %111 = vector.extract_strided_slice %109 {offsets = [0, 0], sizes = [2, 32], strides = [1, 1]} : vector<2x128xf32> to vector<2x32xf32>
    %112 = arith.addf %110, %111 : vector<2x32xf32>
    %113 = arith.negf %112 : vector<2x32xf32>
    %114 = math.exp %113 : vector<2x32xf32>
    %cst_24 = arith.constant 1.000000e+00 : f32
    %115 = vector.broadcast %cst_24 : f32 to vector<2x32xf32>
    %116 = arith.addf %115, %114 : vector<2x32xf32>
    %117 = arith.divf %115, %116 : vector<2x32xf32>
    %118 = vector.extract_strided_slice %107 {offsets = [0, 32], sizes = [2, 32], strides = [1, 1]} : vector<2x128xf32> to vector<2x32xf32>
    %119 = vector.extract_strided_slice %109 {offsets = [0, 32], sizes = [2, 32], strides = [1, 1]} : vector<2x128xf32> to vector<2x32xf32>
    %120 = arith.addf %118, %119 : vector<2x32xf32>
    %121 = arith.negf %120 : vector<2x32xf32>
    %122 = math.exp %121 : vector<2x32xf32>
    %cst_25 = arith.constant 1.000000e+00 : f32
    %123 = vector.broadcast %cst_25 : f32 to vector<2x32xf32>
    %124 = arith.addf %123, %122 : vector<2x32xf32>
    %125 = arith.divf %123, %124 : vector<2x32xf32>
    %126 = vector.extract_strided_slice %107 {offsets = [0, 64], sizes = [2, 32], strides = [1, 1]} : vector<2x128xf32> to vector<2x32xf32>
    %127 = vector.extract_strided_slice %109 {offsets = [0, 64], sizes = [2, 32], strides = [1, 1]} : vector<2x128xf32> to vector<2x32xf32>
    %128 = arith.mulf %117, %127 : vector<2x32xf32>
    %129 = arith.addf %126, %128 : vector<2x32xf32>
    %130 = math.tanh %129 : vector<2x32xf32>
    %cst_26 = arith.constant 1.000000e+00 : f32
    %131 = vector.broadcast %cst_26 : f32 to vector<2x32xf32>
    %132 = arith.subf %131, %125 : vector<2x32xf32>
    %133 = arith.mulf %132, %130 : vector<2x32xf32>
    %134 = arith.mulf %125, %106 : vector<2x32xf32>
    %135 = arith.addf %133, %134 : vector<2x32xf32>
    %136 = vector.extract_strided_slice %14 {offsets = [8, 0], sizes = [2, 128], strides = [1, 1]} : vector<16x128xf32> to vector<2x128xf32>
    %cst_27 = arith.constant dense<0.000000e+00> : vector<2x128xf32>
    %137 = tpu.matmul %135, %15, %cst_27 {dimension_numbers = #tpu.dot_dimension_numbers<[1], [0], [0], [1], [0, 0, 1, 1], [], []>} : vector<2x32xf32>, vector<32x128xf32>, vector<2x128xf32> -> vector<2x128xf32>
    %138 = arith.addf %137, %18 : vector<2x128xf32>
    %139 = vector.extract_strided_slice %136 {offsets = [0, 0], sizes = [2, 32], strides = [1, 1]} : vector<2x128xf32> to vector<2x32xf32>
    %140 = vector.extract_strided_slice %138 {offsets = [0, 0], sizes = [2, 32], strides = [1, 1]} : vector<2x128xf32> to vector<2x32xf32>
    %141 = arith.addf %139, %140 : vector<2x32xf32>
    %142 = arith.negf %141 : vector<2x32xf32>
    %143 = math.exp %142 : vector<2x32xf32>
    %cst_28 = arith.constant 1.000000e+00 : f32
    %144 = vector.broadcast %cst_28 : f32 to vector<2x32xf32>
    %145 = arith.addf %144, %143 : vector<2x32xf32>
    %146 = arith.divf %144, %145 : vector<2x32xf32>
    %147 = vector.extract_strided_slice %136 {offsets = [0, 32], sizes = [2, 32], strides = [1, 1]} : vector<2x128xf32> to vector<2x32xf32>
    %148 = vector.extract_strided_slice %138 {offsets = [0, 32], sizes = [2, 32], strides = [1, 1]} : vector<2x128xf32> to vector<2x32xf32>
    %149 = arith.addf %147, %148 : vector<2x32xf32>
    %150 = arith.negf %149 : vector<2x32xf32>
    %151 = math.exp %150 : vector<2x32xf32>
    %cst_29 = arith.constant 1.000000e+00 : f32
    %152 = vector.broadcast %cst_29 : f32 to vector<2x32xf32>
    %153 = arith.addf %152, %151 : vector<2x32xf32>
    %154 = arith.divf %152, %153 : vector<2x32xf32>
    %155 = vector.extract_strided_slice %136 {offsets = [0, 64], sizes = [2, 32], strides = [1, 1]} : vector<2x128xf32> to vector<2x32xf32>
    %156 = vector.extract_strided_slice %138 {offsets = [0, 64], sizes = [2, 32], strides = [1, 1]} : vector<2x128xf32> to vector<2x32xf32>
    %157 = arith.mulf %146, %156 : vector<2x32xf32>
    %158 = arith.addf %155, %157 : vector<2x32xf32>
    %159 = math.tanh %158 : vector<2x32xf32>
    %cst_30 = arith.constant 1.000000e+00 : f32
    %160 = vector.broadcast %cst_30 : f32 to vector<2x32xf32>
    %161 = arith.subf %160, %154 : vector<2x32xf32>
    %162 = arith.mulf %161, %159 : vector<2x32xf32>
    %163 = arith.mulf %154, %135 : vector<2x32xf32>
    %164 = arith.addf %162, %163 : vector<2x32xf32>
    %165 = vector.extract_strided_slice %14 {offsets = [10, 0], sizes = [2, 128], strides = [1, 1]} : vector<16x128xf32> to vector<2x128xf32>
    %cst_31 = arith.constant dense<0.000000e+00> : vector<2x128xf32>
    %166 = tpu.matmul %164, %15, %cst_31 {dimension_numbers = #tpu.dot_dimension_numbers<[1], [0], [0], [1], [0, 0, 1, 1], [], []>} : vector<2x32xf32>, vector<32x128xf32>, vector<2x128xf32> -> vector<2x128xf32>
    %167 = arith.addf %166, %18 : vector<2x128xf32>
    %168 = vector.extract_strided_slice %165 {offsets = [0, 0], sizes = [2, 32], strides = [1, 1]} : vector<2x128xf32> to vector<2x32xf32>
    %169 = vector.extract_strided_slice %167 {offsets = [0, 0], sizes = [2, 32], strides = [1, 1]} : vector<2x128xf32> to vector<2x32xf32>
    %170 = arith.addf %168, %169 : vector<2x32xf32>
    %171 = arith.negf %170 : vector<2x32xf32>
    %172 = math.exp %171 : vector<2x32xf32>
    %cst_32 = arith.constant 1.000000e+00 : f32
    %173 = vector.broadcast %cst_32 : f32 to vector<2x32xf32>
    %174 = arith.addf %173, %172 : vector<2x32xf32>
    %175 = arith.divf %173, %174 : vector<2x32xf32>
    %176 = vector.extract_strided_slice %165 {offsets = [0, 32], sizes = [2, 32], strides = [1, 1]} : vector<2x128xf32> to vector<2x32xf32>
    %177 = vector.extract_strided_slice %167 {offsets = [0, 32], sizes = [2, 32], strides = [1, 1]} : vector<2x128xf32> to vector<2x32xf32>
    %178 = arith.addf %176, %177 : vector<2x32xf32>
    %179 = arith.negf %178 : vector<2x32xf32>
    %180 = math.exp %179 : vector<2x32xf32>
    %cst_33 = arith.constant 1.000000e+00 : f32
    %181 = vector.broadcast %cst_33 : f32 to vector<2x32xf32>
    %182 = arith.addf %181, %180 : vector<2x32xf32>
    %183 = arith.divf %181, %182 : vector<2x32xf32>
    %184 = vector.extract_strided_slice %165 {offsets = [0, 64], sizes = [2, 32], strides = [1, 1]} : vector<2x128xf32> to vector<2x32xf32>
    %185 = vector.extract_strided_slice %167 {offsets = [0, 64], sizes = [2, 32], strides = [1, 1]} : vector<2x128xf32> to vector<2x32xf32>
    %186 = arith.mulf %175, %185 : vector<2x32xf32>
    %187 = arith.addf %184, %186 : vector<2x32xf32>
    %188 = math.tanh %187 : vector<2x32xf32>
    %cst_34 = arith.constant 1.000000e+00 : f32
    %189 = vector.broadcast %cst_34 : f32 to vector<2x32xf32>
    %190 = arith.subf %189, %183 : vector<2x32xf32>
    %191 = arith.mulf %190, %188 : vector<2x32xf32>
    %192 = arith.mulf %183, %164 : vector<2x32xf32>
    %193 = arith.addf %191, %192 : vector<2x32xf32>
    %194 = vector.extract_strided_slice %14 {offsets = [12, 0], sizes = [2, 128], strides = [1, 1]} : vector<16x128xf32> to vector<2x128xf32>
    %cst_35 = arith.constant dense<0.000000e+00> : vector<2x128xf32>
    %195 = tpu.matmul %193, %15, %cst_35 {dimension_numbers = #tpu.dot_dimension_numbers<[1], [0], [0], [1], [0, 0, 1, 1], [], []>} : vector<2x32xf32>, vector<32x128xf32>, vector<2x128xf32> -> vector<2x128xf32>
    %196 = arith.addf %195, %18 : vector<2x128xf32>
    %197 = vector.extract_strided_slice %194 {offsets = [0, 0], sizes = [2, 32], strides = [1, 1]} : vector<2x128xf32> to vector<2x32xf32>
    %198 = vector.extract_strided_slice %196 {offsets = [0, 0], sizes = [2, 32], strides = [1, 1]} : vector<2x128xf32> to vector<2x32xf32>
    %199 = arith.addf %197, %198 : vector<2x32xf32>
    %200 = arith.negf %199 : vector<2x32xf32>
    %201 = math.exp %200 : vector<2x32xf32>
    %cst_36 = arith.constant 1.000000e+00 : f32
    %202 = vector.broadcast %cst_36 : f32 to vector<2x32xf32>
    %203 = arith.addf %202, %201 : vector<2x32xf32>
    %204 = arith.divf %202, %203 : vector<2x32xf32>
    %205 = vector.extract_strided_slice %194 {offsets = [0, 32], sizes = [2, 32], strides = [1, 1]} : vector<2x128xf32> to vector<2x32xf32>
    %206 = vector.extract_strided_slice %196 {offsets = [0, 32], sizes = [2, 32], strides = [1, 1]} : vector<2x128xf32> to vector<2x32xf32>
    %207 = arith.addf %205, %206 : vector<2x32xf32>
    %208 = arith.negf %207 : vector<2x32xf32>
    %209 = math.exp %208 : vector<2x32xf32>
    %cst_37 = arith.constant 1.000000e+00 : f32
    %210 = vector.broadcast %cst_37 : f32 to vector<2x32xf32>
    %211 = arith.addf %210, %209 : vector<2x32xf32>
    %212 = arith.divf %210, %211 : vector<2x32xf32>
    %213 = vector.extract_strided_slice %194 {offsets = [0, 64], sizes = [2, 32], strides = [1, 1]} : vector<2x128xf32> to vector<2x32xf32>
    %214 = vector.extract_strided_slice %196 {offsets = [0, 64], sizes = [2, 32], strides = [1, 1]} : vector<2x128xf32> to vector<2x32xf32>
    %215 = arith.mulf %204, %214 : vector<2x32xf32>
    %216 = arith.addf %213, %215 : vector<2x32xf32>
    %217 = math.tanh %216 : vector<2x32xf32>
    %cst_38 = arith.constant 1.000000e+00 : f32
    %218 = vector.broadcast %cst_38 : f32 to vector<2x32xf32>
    %219 = arith.subf %218, %212 : vector<2x32xf32>
    %220 = arith.mulf %219, %217 : vector<2x32xf32>
    %221 = arith.mulf %212, %193 : vector<2x32xf32>
    %222 = arith.addf %220, %221 : vector<2x32xf32>
    %223 = vector.extract_strided_slice %14 {offsets = [14, 0], sizes = [2, 128], strides = [1, 1]} : vector<16x128xf32> to vector<2x128xf32>
    %cst_39 = arith.constant dense<0.000000e+00> : vector<2x128xf32>
    %224 = tpu.matmul %222, %15, %cst_39 {dimension_numbers = #tpu.dot_dimension_numbers<[1], [0], [0], [1], [0, 0, 1, 1], [], []>} : vector<2x32xf32>, vector<32x128xf32>, vector<2x128xf32> -> vector<2x128xf32>
    %225 = arith.addf %224, %18 : vector<2x128xf32>
    %226 = vector.extract_strided_slice %223 {offsets = [0, 0], sizes = [2, 32], strides = [1, 1]} : vector<2x128xf32> to vector<2x32xf32>
    %227 = vector.extract_strided_slice %225 {offsets = [0, 0], sizes = [2, 32], strides = [1, 1]} : vector<2x128xf32> to vector<2x32xf32>
    %228 = arith.addf %226, %227 : vector<2x32xf32>
    %229 = arith.negf %228 : vector<2x32xf32>
    %230 = math.exp %229 : vector<2x32xf32>
    %cst_40 = arith.constant 1.000000e+00 : f32
    %231 = vector.broadcast %cst_40 : f32 to vector<2x32xf32>
    %232 = arith.addf %231, %230 : vector<2x32xf32>
    %233 = arith.divf %231, %232 : vector<2x32xf32>
    %234 = vector.extract_strided_slice %223 {offsets = [0, 32], sizes = [2, 32], strides = [1, 1]} : vector<2x128xf32> to vector<2x32xf32>
    %235 = vector.extract_strided_slice %225 {offsets = [0, 32], sizes = [2, 32], strides = [1, 1]} : vector<2x128xf32> to vector<2x32xf32>
    %236 = arith.addf %234, %235 : vector<2x32xf32>
    %237 = arith.negf %236 : vector<2x32xf32>
    %238 = math.exp %237 : vector<2x32xf32>
    %cst_41 = arith.constant 1.000000e+00 : f32
    %239 = vector.broadcast %cst_41 : f32 to vector<2x32xf32>
    %240 = arith.addf %239, %238 : vector<2x32xf32>
    %241 = arith.divf %239, %240 : vector<2x32xf32>
    %242 = vector.extract_strided_slice %223 {offsets = [0, 64], sizes = [2, 32], strides = [1, 1]} : vector<2x128xf32> to vector<2x32xf32>
    %243 = vector.extract_strided_slice %225 {offsets = [0, 64], sizes = [2, 32], strides = [1, 1]} : vector<2x128xf32> to vector<2x32xf32>
    %244 = arith.mulf %233, %243 : vector<2x32xf32>
    %245 = arith.addf %242, %244 : vector<2x32xf32>
    %246 = math.tanh %245 : vector<2x32xf32>
    %cst_42 = arith.constant 1.000000e+00 : f32
    %247 = vector.broadcast %cst_42 : f32 to vector<2x32xf32>
    %248 = arith.subf %247, %241 : vector<2x32xf32>
    %249 = arith.mulf %248, %246 : vector<2x32xf32>
    %250 = arith.mulf %241, %222 : vector<2x32xf32>
    %251 = arith.addf %249, %250 : vector<2x32xf32>
    %252 = tpu.concatenate %48, %77, %106, %135, %164, %193, %222, %251 in 0 : vector<2x32xf32>, vector<2x32xf32>, vector<2x32xf32>, vector<2x32xf32>, vector<2x32xf32>, vector<2x32xf32>, vector<2x32xf32>, vector<2x32xf32> -> vector<16x32xf32>
    %c192 = arith.constant 192 : index
    %c0_43 = arith.constant 0 : index
    %253 = vector.load %arg1[%c192, %c0_43] : memref<784x256xf32, #tpu.memory_space<vmem>>, vector<32x256xf32>
    %cst_44 = arith.constant dense<0.000000e+00> : vector<16x256xf32>
    %254 = tpu.matmul %252, %253, %cst_44 {dimension_numbers = #tpu.dot_dimension_numbers<[1], [0], [0], [1], [0, 0, 1, 1], [], []>} : vector<16x32xf32>, vector<32x256xf32>, vector<16x256xf32> -> vector<16x256xf32>
    %c224 = arith.constant 224 : index
    %c0_45 = arith.constant 0 : index
    %255 = vector.load %arg1[%c224, %c0_45] : memref<784x256xf32, #tpu.memory_space<vmem>>, vector<128x256xf32>
    %cst_46 = arith.constant dense<0.000000e+00> : vector<16x256xf32>
    %256 = tpu.matmul %8, %255, %cst_46 {dimension_numbers = #tpu.dot_dimension_numbers<[1], [0], [0], [1], [0, 0, 1, 1], [], []>} : vector<16x128xf32>, vector<128x256xf32>, vector<16x256xf32> -> vector<16x256xf32>
    %257 = arith.addf %254, %256 : vector<16x256xf32>
    %c760 = arith.constant 760 : index
    %c0_47 = arith.constant 0 : index
    %258 = vector.load %arg1[%c760, %c0_47] : memref<784x256xf32, #tpu.memory_space<vmem>>, vector<1x256xf32>
    %259 = vector.broadcast %258 : vector<1x256xf32> to vector<16x256xf32>
    %260 = arith.addf %257, %259 : vector<16x256xf32>
    %cst_48 = arith.constant 0.000000e+00 : f32
    %261 = vector.broadcast %cst_48 : f32 to vector<16x256xf32>
    %262 = arith.maximumf %260, %261 : vector<16x256xf32>
    %263 = vector.extract_strided_slice %262 {offsets = [0, 0], sizes = [16, 128], strides = [1, 1]} : vector<16x256xf32> to vector<16x128xf32>
    %264 = vector.extract_strided_slice %262 {offsets = [0, 128], sizes = [16, 128], strides = [1, 1]} : vector<16x256xf32> to vector<16x128xf32>
    %c352 = arith.constant 352 : index
    %c0_49 = arith.constant 0 : index
    %265 = vector.load %arg1[%c352, %c0_49] : memref<784x256xf32, #tpu.memory_space<vmem>>, vector<128x128xf32>
    %cst_50 = arith.constant dense<0.000000e+00> : vector<16x128xf32>
    %266 = tpu.matmul %263, %265, %cst_50 {dimension_numbers = #tpu.dot_dimension_numbers<[1], [0], [0], [1], [0, 0, 1, 1], [], []>} : vector<16x128xf32>, vector<128x128xf32>, vector<16x128xf32> -> vector<16x128xf32>
    %c768 = arith.constant 768 : index
    %c0_51 = arith.constant 0 : index
    %267 = vector.load %arg1[%c768, %c0_51] : memref<784x256xf32, #tpu.memory_space<vmem>>, vector<1x128xf32>
    %268 = vector.broadcast %267 : vector<1x128xf32> to vector<16x128xf32>
    %269 = arith.addf %266, %268 : vector<16x128xf32>
    %cst_52 = arith.constant 0.000000e+00 : f32
    %270 = vector.broadcast %cst_52 : f32 to vector<16x128xf32>
    %271 = arith.maximumf %269, %270 : vector<16x128xf32>
    %c480 = arith.constant 480 : index
    %c0_53 = arith.constant 0 : index
    %272 = vector.load %arg1[%c480, %c0_53] : memref<784x256xf32, #tpu.memory_space<vmem>>, vector<128x128xf32>
    %cst_54 = arith.constant dense<0.000000e+00> : vector<16x128xf32>
    %273 = tpu.matmul %271, %272, %cst_54 {dimension_numbers = #tpu.dot_dimension_numbers<[1], [0], [0], [1], [0, 0, 1, 1], [], []>} : vector<16x128xf32>, vector<128x128xf32>, vector<16x128xf32> -> vector<16x128xf32>
    %c608 = arith.constant 608 : index
    %c0_55 = arith.constant 0 : index
    %274 = vector.load %arg1[%c608, %c0_55] : memref<784x256xf32, #tpu.memory_space<vmem>>, vector<128x128xf32>
    %cst_56 = arith.constant dense<0.000000e+00> : vector<16x128xf32>
    %275 = tpu.matmul %264, %274, %cst_56 {dimension_numbers = #tpu.dot_dimension_numbers<[1], [0], [0], [1], [0, 0, 1, 1], [], []>} : vector<16x128xf32>, vector<128x128xf32>, vector<16x128xf32> -> vector<16x128xf32>
    %276 = arith.addf %273, %275 : vector<16x128xf32>
    %c776 = arith.constant 776 : index
    %c0_57 = arith.constant 0 : index
    %277 = vector.load %arg1[%c776, %c0_57] : memref<784x256xf32, #tpu.memory_space<vmem>>, vector<1x128xf32>
    %278 = vector.broadcast %277 : vector<1x128xf32> to vector<16x128xf32>
    %279 = arith.addf %276, %278 : vector<16x128xf32>
    %c0_58 = arith.constant 0 : index
    %c0_59 = arith.constant 0 : index
    %280 = vector.load %arg2[%c0_58, %c0_59] : memref<16x128xf32, #tpu.memory_space<vmem>>, vector<16x128xf32>
    tpu.vector_store %arg2[%c0_58, %c0_59], %279 {strides = array<i32>} : memref<16x128xf32, #tpu.memory_space<vmem>>, vector<16x128xf32>,
    return
  }
}

</mosaic_0001>

<bundles_post_ra>
// kernel: critic_rnn_forward.1
= control target key start
LH: loop header
LB: loop body
LE: loop exit
PB: predicated region body
PF: predicated region fallthrough
CT: control target
= control target key end

     0   :  { %7 = vsyncpa [#allocation3], 0  ;;  %s2258_s9 = smov [#allocation2]   ;;  %s2492_s0 = inlined_call_operand.vmem [shape: f32[16,32], index: 0, kind: input, shape index: {}]   ;;  %s2493_s1 = inlined_call_operand.hbm [shape: f32[784,256], index: 1, kind: input, shape index: {}]   ;;  %s2494_s2 = inlined_call_operand.vmem [shape: f32[16,128], index: 2, kind: output, shape index: {}]  }
   0x1   :  { %s15_s10 = sshll.u32 %s2258_s9, 4  ;;  %s2234_s13 = scalar_lea.hbm %s2493_s1, 25088  ;;  %s16_s10 = int_to_ptr.vmem [resolvable:$true] %s15_s10 }
   0x2   :  { %p2235_p0 = scmp.ne.s32.totalorder %s2493_s1, %s2234_s13  ;;  %p2238_p1 = scmp.lt.u32.totalorder %s2234_s13, %s2493_s1 }
   0x4   :  { %p2240_p2 = pnand %p2238_p1, %p2235_p0 }
   0x6   :  { %2243 = shalt.err (!%p2240_p2)
}
   0x7   :  { %s2244_s18 = scalar_lea.vmem %s16_s10, 25088  ;;  %p2249_p4 = scmp.lt.s32.totalorder %s16_s10, %s16_s10 }
   0x8   :  { %p2245_p3 = scmp.ne.s32.totalorder %s16_s10, %s2244_s18  ;;  %p2250_p5 = scmp.lt.s32.totalorder %s2244_s18, %s2244_s18 }
   0xa   :  { %p2251_p6 = por %p2250_p5, %p2249_p4 }
   0xc   :  { %p2252_p7 = pnand %p2251_p6, %p2245_p3 }
   0xe   :  { %2255 = shalt.err (!%p2252_p7)
}
   0xf   :  { %s2259_s19 = smov 256   ;;  %s2260_s20 = smov 16  }
  0x10   :  { %21 = dma.hbm_to_vmem [thread:$0]  %s2493_s1, 25088, %s16_s10, [#allocation3], %s2259_s19, %s2259_s19, %s2260_s20  }
  0x11   :  { %2256 = dma.done.wait [#allocation3], 25088  }
  0x12   :  { %2257 = vsyncadd [#allocation3], 4294942208  ;;  %v2261_v0 = vmov 0.0   ;;  %v28_v1 = vld [vmem:[#allocation2 + $0x8] sm:$0xff]  ;;  %v30_v2 = vld [vmem:[#allocation2 + $0x18] sm:$0xff]  ;;  %vm48_vm0 = vcmask 261120   ;;  %v38_v46 = vlaneseq }
  0x13   :  { %119 = vmatprep.mubr.f32.mxu0 %v2261_v0  ;;  %v27_v3 = vld [vmem:[#allocation2] sm:$0xff]  ;;  %v1948_v4 = vpack.c.bf16 %v30_v2, %v28_v1  ;;  %v29_v5 = vld [vmem:[#allocation2 + $0x10] sm:$0xff]  ;;  %v32_v6 = vld [vmem:[#allocation2 + $0x28] sm:$0xff]  ;;  %v2262_v25 = vmov 0.0|0.0   ;;  %vm2263_vm1 = vmmov 0   ;;  %s2265_s26 = smov 96  }
  0x14   :  { %v34_v7 = vld [vmem:[#allocation2 + $0x38] sm:$0xff]  ;;  %v1950_v8 = vpack.c.bf16 %v29_v5, %v27_v3  ;;  %v31_v10 = vld [vmem:[#allocation2 + $0x20] sm:$0xff]  ;;  %v33_v11 = vld [vmem:[#allocation2 + $0x30] sm:$0xff]  ;;  %v2322_v47 = vshrl.u32 %v38_v46, 7  ;;  %vm1069_vm2 = vcmask 1041408   ;;  %vm1071_vm3 = vcmask 1043456  }
  0x15   :  { %v1952_v9 = vpack.c.bf16 %v34_v7, %v32_v6  ;;  %1949 = vmatprep.subr.bf16.mxu0 %v1948_v4  ;;  %v1954_v12 = vpack.c.bf16 %v33_v11, %v31_v10  ;;  %v228_v13 = vld [vmem:[#allocation2 + $0x140] sm:$0xff]  ;;  %v229_v14 = vld [vmem:[#allocation2 + $0x150] sm:$0xff]  ;;  %v26_v31 = vld [vmem:[%s2492_s0 + $0x8] sm:$0xff]  ;;  %vm1073_vm4 = vcmask 1045504  }
  0x16   :  { %1951 = vmatpush1.bf16.msra.mxu0 %v1950_v8  ;;  %v136_v15 = vld [vmem:[#allocation2 + $0x40] sm:$0xff]  ;;  %v137_v16 = vld [vmem:[#allocation2 + $0x50] sm:$0xff]  ;;  %v2297_v24 = vpack.c.bf16 %v229_v14, %v228_v13  ;;  %v44_v48 = vsub.s32 1, %v2322_v47 }
  0x17   :  { %1953 = vmatprep.subr.bf16.mxu0 %v1952_v9  ;;  %v138_v17 = vld [vmem:[#allocation2 + $0x60] sm:$0xff]  ;;  %v139_v18 = vld [vmem:[#allocation2 + $0x70] sm:$0xff]  ;;  %v1956_v19 = vpack.c.bf16 %v137_v16, %v136_v15 }
  0x18   :  { %v1960_v20 = vpack.c.bf16 %v139_v18, %v138_v17  ;;  %v140_v21 = vld [vmem:[#allocation2 + $0x80] sm:$0xff]  ;;  %v141_v22 = vld [vmem:[#allocation2 + $0x90] sm:$0xff] }
  0x19   :  { %v25_v23 = vld [vmem:[%s2492_s0] sm:$0xff]  ;;  %1957 = vmatprep.subr.bf16.mxu1 %v1956_v19  ;;  %v231_v27 = vld [vmem:[#allocation2 + $0x170] sm:$0xff]  ;;  %v1964_v28 = vpack.c.bf16 %v141_v22, %v140_v21  ;;  %s2264_s0 = smov 64  }
  0x1a   :  { %1955 = vmatpush1.bf16.msra.mxu0 %v1954_v12  ;;  %v230_v26 = vld [vmem:[#allocation2 + $0x160] sm:$0xff]  ;;  %1959 = vmatpush3.bf16.msra.mxu1 %v1956_v19  ;;  %v143_v30 = vld [vmem:[#allocation2 + $0xb0] sm:$0xff] }
  0x1b   :  { %1988 = vmatprep.subr.bf16.mxu0 %v2262_v25  ;;  %1961 = vmatprep.subr.bf16.mxu1 %v1960_v20  ;;  %v142_v29 = vld [vmem:[#allocation2 + $0xa0] sm:$0xff]  ;;  %v2306_v32 = vpack.c.bf16 %v231_v27, %v230_v26  ;;  %v145_v35 = vld [vmem:[#allocation2 + $0xd0] sm:$0xff] }
  0x1c   :  { %v1968_v33 = vpack.c.bf16 %v143_v30, %v142_v29  ;;  %v144_v34 = vld [vmem:[#allocation2 + $0xc0] sm:$0xff]  ;;  %v147_v38 = vld [vmem:[#allocation2 + $0xf0] sm:$0xff] }
  0x1d   :  { %1589 = vmatmul.mubr.msk.f32.vlgmr.msra.gmra.mrb[0].mxu0 %vm48_vm0, %v25_v23  ;;  %v1972_v36 = vpack.c.bf16 %v145_v35, %v144_v34  ;;  %v146_v37 = vld [vmem:[#allocation2 + $0xe0] sm:$0xff]  ;;  %v149_v41 = vld [vmem:[#allocation2 + $0x110] sm:$0xff] }
  0x1e   :  { %125 = vmatprep.mubr.f32.mxu0 %v2261_v0  ;;  %1990 = vmatpush3.bf16.msra.mxu0 %v2297_v24  ;;  %v1976_v39 = vpack.c.bf16 %v147_v38, %v146_v37  ;;  %v148_v40 = vld [vmem:[#allocation2 + $0x100] sm:$0xff]  ;;  %v151_v44 = vld [vmem:[#allocation2 + $0x130] sm:$0xff] }
  0x1f   :  { %1991 = vmatprep.subr.bf16.mxu0 %v2262_v25  ;;  %1963 = vmatpush3.bf16.msra.mxu1 %v1960_v20  ;;  %v1980_v42 = vpack.c.bf16 %v149_v41, %v148_v40  ;;  %v150_v43 = vld [vmem:[#allocation2 + $0x120] sm:$0xff]  ;;  %v152_v63 = vld [vmem:[#allocation2 + $0x5d0] ss:$0 sm:$0xff] }
  0x20   :  { %1965 = vmatprep.subr.bf16.mxu1 %v1964_v28  ;;  %v1984_v45 = vpack.c.bf16 %v151_v44, %v150_v43  ;;  %v2325_v49 = vld [vmem:[#allocation2 + $0x5c0] ss:$8 sm:$0x3] }
  0x21   :  { %1590 = vmatmul.mubr.msk.f32.gmra.mrb[2].mxu0 %vm48_vm0, %v26_v31  ;;  %v45_v50 = vrot.slane %v2325_v49, %v44_v48  ;;  %v2334_v58 = vld [vmem:[#allocation2 + $0x5e0] ss:$0 sm:$0xff] }
  0x22   :  { %1993 = vmatpush3.bf16.msra.mxu0 %v2306_v32  ;;  %1763 = vmatprep.mubr.msk.f32.mxu0 %vm2263_vm1, %v2261_v0 }
  0x23   :  { %1967 = vmatpush3.bf16.msra.mxu1 %v1964_v28  ;;  %1994 = vmatprep.subr.bf16.mxu0 %v2262_v25 }
  0x24   :  { %1969 = vmatprep.subr.bf16.mxu1 %v1968_v33 }
  0x25   :  { %1764 = vmatmul.mubr.f32.vlgmr.msra.gmra.mrb[4].mxu0 %v2261_v0 }
  0x26   :  { %1996 = vmatpush3.bf16.msra.mxu0 %v2297_v24  ;;  %1774 = vmatprep.mubr.msk.f32.mxu0 %vm2263_vm1, %v2261_v0 }
  0x27   :  { %1971 = vmatpush3.bf16.msra.mxu1 %v1968_v33  ;;  %1997 = vmatprep.subr.bf16.mxu0 %v2262_v25 }
  0x28   :  { %1973 = vmatprep.subr.bf16.mxu1 %v1972_v36 }
  0x2a   :  { %1999 = vmatpush3.bf16.msra.mxu0 %v2306_v32 }
  0x2b   :  { %1975 = vmatpush3.bf16.msra.mxu1 %v1972_v36  ;;  %2000 = vmatprep.subr.bf16.mxu0 %v2262_v25 }
  0x2c   :  { %1977 = vmatprep.subr.bf16.mxu1 %v1976_v39 }
  0x2f   :  { %1979 = vmatpush3.bf16.msra.mxu1 %v1976_v39 }
  0x30   :  { %1981 = vmatprep.subr.bf16.mxu1 %v1980_v42 }
  0x33   :  { %1983 = vmatpush3.bf16.msra.mxu1 %v1980_v42 }
  0x34   :  { %1985 = vmatprep.subr.bf16.mxu1 %v1984_v45 }
  0x37   :  { %1987 = vmatpush3.bf16.msra.mxu1 %v1984_v45 }
  0x38   :  { %2012 = vmatprep.subr.bf16.mxu1 %v2262_v25 }
  0xf0   :  { %v2330_v51 = vpop.f32.mrb[0].mxu0 }
  0xf1   :  { %v123_v52 = vpop.f32.mrb[1].mxu0 }
  0xf2   :  { %v124_v53 = vadd.f32 %v123_v52, %v45_v50 }
  0xf4   :  { %v2332_v54 = vpop.f32.mrb[2].mxu0  ;;  %v133_v55 = vmax.f32 %v124_v53, 0.0 }
  0xf5   :  { %v129_v56 = vpop.f32.mrb[3].mxu0 }
  0xf6   :  { %v130_v57 = vadd.f32 %v129_v56, %v45_v50  ;;  %1752 = vmatprep.mubr.f32.mxu1 %v133_v55 }
  0xf8   :  { %v135_v59 = vmax.f32 %v130_v57, 0.0  ;;  %v302_v60 = vpop.f32.mrb[4].mxu0 }
  0xf9   :  { %v303_v61 = vadd.f32 %v302_v60, %v2334_v58  ;;  %v1765_v62 = vpop.f32.mrb[5].mxu0 }
  0xfa   :  { %1753 = vmatmul.mubr.f32.vlgmr.msra.gmra.mrb[0].mxu1 %v135_v59 }
  0xfb   :  { %314 = vrot.lane.b32.xlu0 %v303_v61, %s2264_s0  ;;  %2014 = vmatpush3.bf16.msra.mxu1 %v2297_v24 }
  0xfc   :  { %2015 = vmatprep.subr.bf16.mxu1 %v2262_v25  ;;  %1807 = vmatprep.mubr.msk.f32.mxu1 %vm2263_vm1, %v2261_v0 }
  0xff   :  { %2017 = vmatpush3.bf16.msra.mxu1 %v2306_v32 }
 0x100   :  { %2024 = vmatprep.subr.bf16.mxu1 %v2262_v25 }
 0x16d   :  { %v315_v9 = vpop.permute.xlu0 %314 }
 0x1cd   :  { %v1754_v1 = vpop.f32.mrb[0].mxu1 }
 0x1ce   :  { %v2344_v2 = vadd.f32 %v1754_v1, %v152_v63  ;;  %v219_v3 = vpop.f32.mrb[1].mxu1 }
 0x1cf   :  { %v2346_v4 = vadd.f32 %v219_v3, %v152_v63 }
 0x1d1   :  { %v306_v5 = vadd.f32 %v303_v61, %v2346_v4 }
 0x1d3   :  { %v1591_v6 = vmul.f32 -1.442695, %v306_v5 }
 0x1d5   :  { %2186 = vpow2.f32 %v1591_v6 }
 0x1df   :  { %v2187_v7 = vpop.eup %2186 }
 0x1e0   :  { %v310_v8 = vadd.f32 1.0, %v2187_v7 }
 0x1e2   :  { %2188 = vrcp.f32 %v310_v8 }
 0x1ec   :  { %v2189_v10 = vpop.eup %2188 }
 0x1ed   :  { %v317_v11 = vmul.f32 %v2189_v10, %v315_v9  ;;  %v324_v15 = vsub.f32 1.0, %v2189_v10  ;;  %v330_v17 = vmul.f32 0.0, %v2189_v10 }
 0x1ef   :  { %319 = vrot.lane.b32.xlu0 %v317_v11, %s2264_s0 }
 0x261   :  { %v320_v12 = vpop.permute.xlu0 %319 }
 0x262   :  { %v322_v13 = vadd.f32 %v320_v12, %v2346_v4 }
 0x264   :  { %2190 = vtanh.f32 %v322_v13 }
 0x26e   :  { %v2191_v14 = vpop.eup %2190 }
 0x26f   :  { %326 = vrot.lane.b32.xlu1 %v2191_v14, %s2265_s26 }
 0x2e1   :  { %v327_v16 = vpop.permute.xlu1 %326 }
 0x2e2   :  { %v329_v18 = vmul.f32 %v327_v16, %v324_v15 }
 0x2e4   :  { %v2352_v19 = vadd.f32 %v330_v17, %v329_v18 }
 0x2e6   :  { %333 = vrot.lane.b32.xlu1 %v2352_v19, %s2265_s26  ;;  %v433_v39 = vrot.slane %v2352_v19, 6 }
 0x358   :  { %v334_v20 = vpop.permute.xlu1 %333 }
 0x359   :  { %1775 = vmatmul.mubr.msk.f32.vlgmr.msra.gmra.mrb[6].mxu0 %vm48_vm0, %v334_v20 }
 0x35a   :  { %2002 = vmatpush3.bf16.msra.mxu0 %v2297_v24  ;;  %1785 = vmatprep.mubr.msk.f32.mxu0 %vm2263_vm1, %v2261_v0 }
 0x35b   :  { %2003 = vmatprep.subr.bf16.mxu0 %v2262_v25 }
 0x35e   :  { %2005 = vmatpush3.bf16.msra.mxu0 %v2306_v32 }
 0x35f   :  { %2006 = vmatprep.subr.bf16.mxu0 %v2262_v25 }
 0x42c   :  { %v403_v21 = vpop.f32.mrb[6].mxu0 }
 0x42d   :  { %v404_v22 = vadd.f32 %v403_v21, %v2334_v58  ;;  %v1776_v23 = vpop.f32.mrb[7].mxu0 }
 0x42f   :  { %v408_v26 = vrot.slane %v404_v22, 6 }
 0x431   :  { %417 = vrot.lane.b32.xlu0 %v408_v26, %s2264_s0  ;;  %v410_v27 = vadd.f32 %v408_v26, %v2346_v4 }
 0x433   :  { %v1593_v28 = vmul.f32 -1.442695, %v410_v27 }
 0x435   :  { %2192 = vpow2.f32 %v1593_v28 }
 0x43f   :  { %v2193_v29 = vpop.eup %2192 }
 0x440   :  { %v414_v30 = vadd.f32 1.0, %v2193_v29 }
 0x442   :  { %2194 = vrcp.f32 %v414_v30 }
 0x44c   :  { %v2195_v31 = vpop.eup %2194 }
 0x44d   :  { %v427_v38 = vsub.f32 1.0, %v2195_v31  ;;  %v435_v42 = vmul.f32 %v2195_v31, %v433_v39 }
 0x4a3   :  { %v418_v33 = vpop.permute.xlu0 %417 }
 0x4a4   :  { %v420_v34 = vmul.f32 %v2195_v31, %v418_v33 }
 0x4a6   :  { %422 = vrot.lane.b32.xlu1 %v420_v34, %s2264_s0 }
 0x518   :  { %v423_v35 = vpop.permute.xlu1 %422 }
 0x519   :  { %v425_v36 = vadd.f32 %v423_v35, %v2346_v4 }
 0x51b   :  { %2196 = vtanh.f32 %v425_v36 }
 0x525   :  { %v2197_v37 = vpop.eup %2196 }
 0x526   :  { %429 = vrot.lane.b32.xlu0 %v2197_v37, %s2265_s26 }
 0x598   :  { %v430_v40 = vpop.permute.xlu0 %429 }
 0x599   :  { %v432_v41 = vmul.f32 %v430_v40, %v427_v38 }
 0x59b   :  { %v436_v43 = vadd.f32 %v435_v42, %v432_v41 }
 0x59d   :  { %v438_v44 = vrot.slane %v436_v43, 2  ;;  %v539_v6 = vrot.slane %v436_v43, 6  ;;  %v1070_v11 = vsel %vm1069_vm2, %v2352_v19, %v436_v43 }
 0x59f   :  { %439 = vrot.lane.b32.xlu1 %v438_v44, %s2265_s26 }
 0x611   :  { %v440_v45 = vpop.permute.xlu1 %439 }
 0x612   :  { %1786 = vmatmul.mubr.msk.f32.vlgmr.msra.gmra.mrb[8].mxu0 %vm48_vm0, %v440_v45 }
 0x613   :  { %2008 = vmatpush3.bf16.msra.mxu0 %v2297_v24  ;;  %1796 = vmatprep.mubr.msk.f32.mxu0 %vm2263_vm1, %v2261_v0 }
 0x614   :  { %2009 = vmatprep.subr.bf16.mxu0 %v2262_v25 }
 0x617   :  { %2011 = vmatpush3.bf16.msra.mxu0 %v2306_v32 }
 0x618   :  { %2018 = vmatprep.subr.bf16.mxu0 %v2262_v25 }
 0x6e5   :  { %v509_v46 = vpop.f32.mrb[8].mxu0 }
 0x6e6   :  { %v510_v50 = vadd.f32 %v509_v46, %v2334_v58  ;;  %v1787_v52 = vpop.f32.mrb[9].mxu0 }
 0x6e8   :  { %v514_v53 = vrot.slane %v510_v50, 4 }
 0x6ea   :  { %523 = vrot.lane.b32.xlu0 %v514_v53, %s2264_s0  ;;  %v516_v55 = vadd.f32 %v514_v53, %v2346_v4 }
 0x6ec   :  { %v1595_v56 = vmul.f32 -1.442695, %v516_v55 }
 0x6ee   :  { %2198 = vpow2.f32 %v1595_v56 }
 0x6f8   :  { %v2199_v57 = vpop.eup %2198 }
 0x6f9   :  { %v520_v59 = vadd.f32 1.0, %v2199_v57 }
 0x6fb   :  { %2200 = vrcp.f32 %v520_v59 }
 0x705   :  { %v2201_v60 = vpop.eup %2200 }
 0x706   :  { %v533_v5 = vsub.f32 1.0, %v2201_v60  ;;  %v541_v8 = vmul.f32 %v2201_v60, %v539_v6 }
 0x75c   :  { %v524_v61 = vpop.permute.xlu0 %523 }
 0x75d   :  { %v526_v62 = vmul.f32 %v2201_v60, %v524_v61 }
 0x75f   :  { %528 = vrot.lane.b32.xlu1 %v526_v62, %s2264_s0 }
 0x7d1   :  { %v529_v63 = vpop.permute.xlu1 %528 }
 0x7d2   :  { %v531_v1 = vadd.f32 %v529_v63, %v2346_v4 }
 0x7d4   :  { %2202 = vtanh.f32 %v531_v1 }
 0x7de   :  { %v2203_v3 = vpop.eup %2202 }
 0x7df   :  { %535 = vrot.lane.b32.xlu0 %v2203_v3, %s2265_s26 }
 0x851   :  { %v536_v7 = vpop.permute.xlu0 %535 }
 0x852   :  { %v538_v9 = vmul.f32 %v536_v7, %v533_v5 }
 0x854   :  { %v542_v10 = vadd.f32 %v541_v8, %v538_v9 }
 0x856   :  { %v544_v12 = vrot.slane %v542_v10, 4  ;;  %v1072_v13 = vsel %vm1071_vm3, %v1070_v11, %v542_v10  ;;  %v645_v33 = vrot.slane %v542_v10, 6 }
 0x858   :  { %545 = vrot.lane.b32.xlu1 %v544_v12, %s2265_s26 }
 0x8ca   :  { %v546_v14 = vpop.permute.xlu1 %545 }
 0x8cb   :  { %1797 = vmatmul.mubr.msk.f32.vlgmr.msra.gmra.mrb[10].mxu0 %vm48_vm0, %v546_v14  ;;  %v1087_v14 = vld [vmem:[#allocation2 + $0x1c8] sm:$0xff] }
 0x8cc   :  { %2020 = vmatpush3.bf16.msra.mxu0 %v2297_v24  ;;  %1818 = vmatprep.mubr.msk.f32.mxu0 %vm2263_vm1, %v2261_v0 }
 0x8cd   :  { %2021 = vmatprep.subr.bf16.mxu0 %v2262_v25 }
 0x8d0   :  { %2023 = vmatpush3.bf16.msra.mxu0 %v2306_v32 }
 0x8d1   :  { %2030 = vmatprep.subr.bf16.mxu0 %v2262_v25 }
 0x99e   :  { %v615_v15 = vpop.f32.mrb[10].mxu0 }
 0x99f   :  { %v616_v16 = vadd.f32 %v615_v15, %v2334_v58  ;;  %v1798_v17 = vpop.f32.mrb[11].mxu0  ;;  %v1089_v15 = vld [vmem:[#allocation2 + $0x1d8] sm:$0xff] }
 0x9a1   :  { %v620_v18 = vrot.slane %v616_v16, 2  ;;  %v2036_v16 = vpack.c.bf16 %v1089_v15, %v1087_v14 }
 0x9a3   :  { %629 = vrot.lane.b32.xlu0 %v620_v18, %s2264_s0  ;;  %v622_v19 = vadd.f32 %v620_v18, %v2346_v4 }
 0x9a5   :  { %v1597_v20 = vmul.f32 -1.442695, %v622_v19 }
 0x9a7   :  { %2204 = vpow2.f32 %v1597_v20 }
 0x9b1   :  { %v2205_v21 = vpop.eup %2204 }
 0x9b2   :  { %v626_v22 = vadd.f32 1.0, %v2205_v21 }
 0x9b4   :  { %2206 = vrcp.f32 %v626_v22 }
 0x9be   :  { %v2207_v23 = vpop.eup %2206 }
 0x9bf   :  { %v639_v31 = vsub.f32 1.0, %v2207_v23  ;;  %v647_v35 = vmul.f32 %v2207_v23, %v645_v33 }
 0xa15   :  { %v630_v26 = vpop.permute.xlu0 %629 }
 0xa16   :  { %v632_v27 = vmul.f32 %v2207_v23, %v630_v26 }
 0xa18   :  { %634 = vrot.lane.b32.xlu1 %v632_v27, %s2264_s0  ;;  %v1086_v27 = vld [vmem:[#allocation2 + $0x1c0] sm:$0xff] }
 0xa8a   :  { %v635_v28 = vpop.permute.xlu1 %634 }
 0xa8b   :  { %v637_v29 = vadd.f32 %v635_v28, %v2346_v4  ;;  %v1088_v28 = vld [vmem:[#allocation2 + $0x1d0] sm:$0xff] }
 0xa8d   :  { %2208 = vtanh.f32 %v637_v29  ;;  %v1091_v29 = vld [vmem:[#allocation2 + $0x1e8] sm:$0xff] }
 0xa97   :  { %v2209_v30 = vpop.eup %2208 }
 0xa98   :  { %641 = vrot.lane.b32.xlu0 %v2209_v30, %s2265_s26  ;;  %v1093_v30 = vld [vmem:[#allocation2 + $0x1f8] sm:$0xff] }
 0xa99   :  { %v2040_v33 = vpack.c.bf16 %v1093_v30, %v1091_v29 }
 0xb0a   :  { %v642_v34 = vpop.permute.xlu0 %641 }
 0xb0b   :  { %v644_v36 = vmul.f32 %v642_v34, %v639_v31  ;;  %v2038_v31 = vpack.c.bf16 %v1088_v28, %v1086_v27  ;;  %v1090_v34 = vld [vmem:[#allocation2 + $0x1e0] sm:$0xff] }
 0xb0d   :  { %v648_v37 = vadd.f32 %v647_v35, %v644_v36  ;;  %v1092_v35 = vld [vmem:[#allocation2 + $0x1f0] sm:$0xff] }
 0xb0f   :  { %v650_v38 = vrot.slane %v648_v37, 6  ;;  %v2402_v39 = vsel %vm1073_vm4, %v1072_v13, %v648_v37  ;;  %v1095_v37 = vld [vmem:[#allocation2 + $0x208] sm:$0xff] }
 0xb11   :  { %651 = vrot.lane.b32.xlu1 %v650_v38, %s2265_s26 }
 0xb83   :  { %v652_v40 = vpop.permute.xlu1 %651 }
 0xb84   :  { %1808 = vmatmul.mubr.msk.f32.vlgmr.msra.gmra.mrb[2].mxu1 %vm48_vm0, %v652_v40  ;;  %v2042_v40 = vpack.c.bf16 %v1092_v35, %v1090_v34 }
 0xb85   :  { %2026 = vmatpush3.bf16.msra.mxu1 %v2297_v24  ;;  %1829 = vmatprep.mubr.msk.f32.mxu1 %vm2263_vm1, %v2261_v0 }
 0xb86   :  { %2027 = vmatprep.subr.bf16.mxu1 %v2262_v25 }
 0xb89   :  { %2029 = vmatpush3.bf16.msra.mxu1 %v2306_v32 }
 0xb8a   :  { %2037 = vmatprep.subr.bf16.mxu1 %v2036_v16  ;;  %v1114_v16 = vld [vmem:[#allocation2 + $0x2a0] sm:$0xff] }
 0xc57   :  { %v721_v4 = vpop.f32.mrb[2].mxu1 }
 0xc58   :  { %v722_v41 = vadd.f32 %v721_v4, %v2334_v58  ;;  %v1809_v42 = vpop.f32.mrb[3].mxu1 }
 0xc59   :  { %v1096_v42 = vld [vmem:[#allocation2 + $0x210] sm:$0xff] }
 0xc5a   :  { %733 = vrot.lane.b32.xlu0 %v722_v41, %s2264_s0  ;;  %v725_v43 = vadd.f32 %v722_v41, %v2344_v2  ;;  %v1094_v41 = vld [vmem:[#allocation2 + $0x200] sm:$0xff] }
 0xc5c   :  { %v1599_v44 = vmul.f32 -1.442695, %v725_v43  ;;  %v1099_v43 = vld [vmem:[#allocation2 + $0x228] sm:$0xff] }
 0xc5e   :  { %2210 = vpow2.f32 %v1599_v44  ;;  %v1101_v44 = vld [vmem:[#allocation2 + $0x238] sm:$0xff] }
 0xc68   :  { %v2211_v45 = vpop.eup %2210 }
 0xc69   :  { %v729_v46 = vadd.f32 1.0, %v2211_v45  ;;  %v2046_v45 = vpack.c.bf16 %v1096_v42, %v1094_v41 }
 0xc6b   :  { %2212 = vrcp.f32 %v729_v46  ;;  %v2048_v46 = vpack.c.bf16 %v1101_v44, %v1099_v43 }
 0xc75   :  { %v2213_v50 = vpop.eup %2212 }
 0xc76   :  { %v743_v59 = vsub.f32 1.0, %v2213_v50  ;;  %v750_v61 = vmul.f32 %v2213_v50, %v650_v38  ;;  %v1097_v38 = vld [vmem:[#allocation2 + $0x218] sm:$0xff] }
 0xc77   :  { %v2044_v4 = vpack.c.bf16 %v1097_v38, %v1095_v37 }
 0xccc   :  { %v734_v52 = vpop.permute.xlu0 %733 }
 0xccd   :  { %v736_v53 = vmul.f32 %v2213_v50, %v734_v52  ;;  %v1098_v50 = vld [vmem:[#allocation2 + $0x220] sm:$0xff]  ;;  %v1100_v52 = vld [vmem:[#allocation2 + $0x230] sm:$0xff] }
 0xccf   :  { %738 = vrot.lane.b32.xlu1 %v736_v53, %s2264_s0  ;;  %v1103_v53 = vld [vmem:[#allocation2 + $0x248] sm:$0xff] }
 0xd41   :  { %v739_v55 = vpop.permute.xlu1 %738 }
 0xd42   :  { %v741_v56 = vadd.f32 %v739_v55, %v2344_v2  ;;  %v1105_v55 = vld [vmem:[#allocation2 + $0x258] sm:$0xff] }
 0xd44   :  { %2214 = vtanh.f32 %v741_v56  ;;  %v2050_v56 = vpack.c.bf16 %v1100_v52, %v1098_v50  ;;  %v1079_v52 = vld [vmem:[#allocation2 + $0x188] sm:$0xff] }
 0xd4e   :  { %v2215_v57 = vpop.eup %2214 }
 0xd4f   :  { %745 = vrot.lane.b32.xlu0 %v2215_v57, %s2265_s26  ;;  %v2052_v57 = vpack.c.bf16 %v1105_v55, %v1103_v53  ;;  %v1081_v53 = vld [vmem:[#allocation2 + $0x198] sm:$0xff]  ;;  %v1078_v55 = vld [vmem:[#allocation2 + $0x180] sm:$0xff] }
 0xdc1   :  { %v746_v60 = vpop.permute.xlu0 %745 }
 0xdc2   :  { %v748_v62 = vmul.f32 %v746_v60, %v743_v59  ;;  %v1102_v59 = vld [vmem:[#allocation2 + $0x240] sm:$0xff]  ;;  %v1104_v60 = vld [vmem:[#allocation2 + $0x250] sm:$0xff] }
 0xdc4   :  { %v2417_v63 = vadd.f32 %v750_v61, %v748_v62  ;;  %v1107_v61 = vld [vmem:[#allocation2 + $0x268] sm:$0xff]  ;;  %v1109_v62 = vld [vmem:[#allocation2 + $0x278] sm:$0xff] }
 0xdc6   :  { %753 = vrot.lane.b32.xlu1 %v2417_v63, %s2265_s26  ;;  %v853_v19 = vrot.slane %v2417_v63, 6 }
 0xe38   :  { %v754_v1 = vpop.permute.xlu1 %753 }
 0xe39   :  { %1819 = vmatmul.mubr.msk.f32.vlgmr.msra.gmra.mrb[12].mxu0 %vm48_vm0, %v754_v1  ;;  %v2054_v1 = vpack.c.bf16 %v1104_v60, %v1102_v59 }
 0xe3a   :  { %2032 = vmatpush3.bf16.msra.mxu0 %v2297_v24  ;;  %1840 = vmatprep.mubr.msk.f32.mxu0 %vm2263_vm1, %v2261_v0 }
 0xe3b   :  { %2033 = vmatprep.subr.bf16.mxu0 %v2262_v25 }
 0xe3e   :  { %2035 = vmatpush3.bf16.msra.mxu0 %v2306_v32 }
 0xf0c   :  { %v823_v3 = vpop.f32.mrb[12].mxu0 }
 0xf0d   :  { %v824_v5 = vadd.f32 %v823_v3, %v2334_v58  ;;  %v1820_v6 = vpop.f32.mrb[13].mxu0  ;;  %v2056_v3 = vpack.c.bf16 %v1109_v62, %v1107_v61 }
 0xf0e   :  { %v1108_v6 = vld [vmem:[#allocation2 + $0x270] sm:$0xff] }
 0xf0f   :  { %v828_v7 = vrot.slane %v824_v5, 6  ;;  %v1106_v5 = vld [vmem:[#allocation2 + $0x260] sm:$0xff] }
 0xf11   :  { %837 = vrot.lane.b32.xlu0 %v828_v7, %s2264_s0  ;;  %v830_v8 = vadd.f32 %v828_v7, %v2344_v2  ;;  %v1111_v7 = vld [vmem:[#allocation2 + $0x288] sm:$0xff] }
 0xf13   :  { %v1601_v9 = vmul.f32 -1.442695, %v830_v8  ;;  %v1113_v8 = vld [vmem:[#allocation2 + $0x298] sm:$0xff] }
 0xf15   :  { %2216 = vpow2.f32 %v1601_v9  ;;  %v2058_v9 = vpack.c.bf16 %v1108_v6, %v1106_v5  ;;  %v1083_v6 = vld [vmem:[#allocation2 + $0x1a8] sm:$0xff] }
 0xf1f   :  { %v2217_v10 = vpop.eup %2216 }
 0xf20   :  { %v834_v24 = vadd.f32 1.0, %v2217_v10  ;;  %v40_v10 = vsub.s32 0, %v2322_v47 }
 0xf22   :  { %2218 = vrcp.f32 %v834_v24  ;;  %v2060_v24 = vpack.c.bf16 %v1113_v8, %v1111_v7  ;;  %v41_v14 = vrot.slane %v2325_v49, %v40_v10  ;;  %v1085_v7 = vld [vmem:[#allocation2 + $0x1b8] sm:$0xff] }
 0xf23   :  { %v2072_v8 = vpack.c.bf16 %v1085_v7, %v1083_v6  ;;  %v1283_v7 = vld [vmem:[#allocation2 + $0x5f0] ss:$8 sm:$0x3] }
 0xf2c   :  { %v2219_v11 = vpop.eup %2218 }
 0xf2d   :  { %v847_v18 = vsub.f32 1.0, %v2219_v11  ;;  %v855_v21 = vmul.f32 %v2219_v11, %v853_v19  ;;  %v122_v19 = vadd.f32 %v2330_v51, %v41_v14 }
 0xf83   :  { %v838_v12 = vpop.permute.xlu0 %837 }
 0xf84   :  { %v840_v13 = vmul.f32 %v2219_v11, %v838_v12  ;;  %v1110_v11 = vld [vmem:[#allocation2 + $0x280] sm:$0xff]  ;;  %v1112_v12 = vld [vmem:[#allocation2 + $0x290] sm:$0xff] }
 0xf86   :  { %842 = vrot.lane.b32.xlu1 %v840_v13, %s2264_s0  ;;  %v1115_v13 = vld [vmem:[#allocation2 + $0x2a8] sm:$0xff] }
 0xff8   :  { %v843_v25 = vpop.permute.xlu1 %842 }
 0xff9   :  { %v845_v32 = vadd.f32 %v843_v25, %v2344_v2  ;;  %v1117_v25 = vld [vmem:[#allocation2 + $0x2b8] sm:$0xff] }
 0xffa   :  { %v2064_v15 = vpack.c.bf16 %v1117_v25, %v1115_v13 }
 0xffb   :  { %2220 = vtanh.f32 %v845_v32  ;;  %v2062_v32 = vpack.c.bf16 %v1112_v12, %v1110_v11 }
0x1005   :  { %v2221_v17 = vpop.eup %2220 }
0x1006   :  { %849 = vrot.lane.b32.xlu0 %v2221_v17, %s2265_s26  ;;  %v1116_v17 = vld [vmem:[#allocation2 + $0x2b0] sm:$0xff] }
0x1078   :  { %v850_v20 = vpop.permute.xlu0 %849 }
0x1079   :  { %v852_v22 = vmul.f32 %v850_v20, %v847_v18  ;;  %v2066_v18 = vpack.c.bf16 %v1116_v17, %v1114_v16  ;;  %v132_v20 = vmax.f32 %v122_v19, 0.0  ;;  %v1303_v16 = vld [vmem:[#allocation2 + $0x2c0] sm:$0xff]  ;;  %v1304_v17 = vld [vmem:[#allocation2 + $0x2d0] sm:$0xff] }
0x107a   :  { %v2076_v19 = vpack.c.bf16 %v1304_v17, %v1303_v16  ;;  %v1427_v17 = vld [vmem:[#allocation2 + $0x5a0] sm:$0xff] }
0x107b   :  { %v2434_v23 = vadd.f32 %v855_v21, %v852_v22  ;;  %v128_v21 = vadd.f32 %v2332_v54, %v41_v14 }
0x107d   :  { %v858_v26 = vrot.slane %v2434_v23, 2  ;;  %v134_v22 = vmax.f32 %v128_v21, 0.0  ;;  %v1075_v44 = vsel %vm1069_vm2, %v2417_v63, %v2434_v23  ;;  %v1305_v21 = vld [vmem:[#allocation2 + $0x2e0] sm:$0xff] }
0x107f   :  { %859 = vrot.lane.b32.xlu1 %v858_v26, %s2265_s26 }
0x10f1   :  { %v860_v36 = vpop.permute.xlu1 %859 }
0x10f2   :  { %1830 = vmatmul.mubr.msk.f32.vlgmr.msra.gmra.mrb[4].mxu1 %vm48_vm0, %v860_v36 }
0x10f3   :  { %2039 = vmatpush1.bf16.msra.mxu1 %v2038_v31  ;;  %1182 = vmatprep.mubr.f32.mxu1 %v2261_v0 }
0x10f4   :  { %2041 = vmatprep.subr.bf16.mxu1 %v2040_v33 }
0x10f7   :  { %2043 = vmatpush1.bf16.msra.mxu1 %v2042_v40  ;;  %v959_v40 = vrot.slane %v2434_v23, 6 }
0x10f8   :  { %2045 = vmatprep.subr.bf16.mxu1 %v2044_v4 }
0x10fb   :  { %2047 = vmatpush1.bf16.msra.mxu1 %v2046_v45 }
0x10fc   :  { %2049 = vmatprep.subr.bf16.mxu1 %v2048_v46 }
0x10ff   :  { %2051 = vmatpush1.bf16.msra.mxu1 %v2050_v56  ;;  %v2068_v56 = vpack.c.bf16 %v1081_v53, %v1079_v52  ;;  %v1421_v52 = vld [vmem:[#allocation2 + $0x540] sm:$0xff]  ;;  %v1422_v53 = vld [vmem:[#allocation2 + $0x550] sm:$0xff] }
0x1100   :  { %2053 = vmatprep.subr.bf16.mxu1 %v2052_v57  ;;  %v1080_v57 = vld [vmem:[#allocation2 + $0x190] sm:$0xff] }
0x1101   :  { %v2070_v60 = vpack.c.bf16 %v1080_v57, %v1078_v55  ;;  %v1313_v57 = vld [vmem:[#allocation2 + $0x360] sm:$0xff] }
0x1103   :  { %2055 = vmatpush1.bf16.msra.mxu1 %v2054_v1 }
0x1104   :  { %2057 = vmatprep.subr.bf16.mxu1 %v2056_v3 }
0x1107   :  { %2059 = vmatpush1.bf16.msra.mxu1 %v2058_v9  ;;  %v1082_v9 = vld [vmem:[#allocation2 + $0x1a0] sm:$0xff] }
0x1108   :  { %2061 = vmatprep.subr.bf16.mxu1 %v2060_v24  ;;  %v1084_v24 = vld [vmem:[#allocation2 + $0x1b0] sm:$0xff] }
0x1109   :  { %v2074_v11 = vpack.c.bf16 %v1084_v24, %v1082_v9 }
0x110b   :  { %2063 = vmatpush1.bf16.msra.mxu1 %v2062_v32 }
0x110c   :  { %2065 = vmatprep.subr.bf16.mxu1 %v2064_v15 }
0x110f   :  { %2067 = vmatpush1.bf16.msra.mxu1 %v2066_v18  ;;  %v1413_v18 = vld [vmem:[#allocation2 + $0x4c0] sm:$0xff] }
0x1110   :  { %2069 = vmatprep.subr.bf16.mxu1 %v2068_v56  ;;  %v2124_v56 = vpack.c.bf16 %v1422_v53, %v1421_v52 }
0x1112   :  { %1183 = vmatmul.mubr.f32.vlgmr.msra.gmra.mrb[6].mxu1 %v132_v20  ;;  %v1414_v20 = vld [vmem:[#allocation2 + $0x4d0] sm:$0xff] }
0x1113   :  { %1188 = vmatprep.mubr.f32.mxu1 %v2261_v0  ;;  %2071 = vmatpush1.bf16.msra.mxu1 %v2070_v60  ;;  %v1423_v60 = vld [vmem:[#allocation2 + $0x560] sm:$0xff] }
0x1114   :  { %2073 = vmatprep.subr.bf16.mxu1 %v2072_v8  ;;  %v1292_v8 = vrot.slane %v1283_v7, %v44_v48 }
0x1116   :  { %1189 = vmatmul.mubr.f32.gmra.mrb[8].mxu1 %v134_v22  ;;  %v1306_v22 = vld [vmem:[#allocation2 + $0x2f0] sm:$0xff] }
0x1117   :  { %1269 = vmatprep.mubr.f32.mxu1 %v2261_v0  ;;  %2075 = vmatpush1.bf16.msra.mxu1 %v2074_v11 }
0x1118   :  { %2077 = vmatprep.subr.bf16.mxu1 %v2076_v19 }
0x11c5   :  { %v929_v49 = vpop.f32.mrb[4].mxu1 }
0x11c6   :  { %v930_v26 = vadd.f32 %v929_v49, %v2334_v58  ;;  %v1831_v27 = vpop.f32.mrb[5].mxu1  ;;  %v2080_v49 = vpack.c.bf16 %v1306_v22, %v1305_v21 }
0x11c7   :  { %v1307_v27 = vld [vmem:[#allocation2 + $0x300] sm:$0xff] }
0x11c8   :  { %v934_v28 = vrot.slane %v930_v26, 4  ;;  %v1415_v26 = vld [vmem:[#allocation2 + $0x4e0] sm:$0xff] }
0x11ca   :  { %943 = vrot.lane.b32.xlu0 %v934_v28, %s2264_s0  ;;  %v936_v51 = vadd.f32 %v934_v28, %v2344_v2 }
0x11cc   :  { %v1603_v29 = vmul.f32 -1.442695, %v936_v51  ;;  %v1308_v51 = vld [vmem:[#allocation2 + $0x310] sm:$0xff] }
0x11ce   :  { %2222 = vpow2.f32 %v1603_v29  ;;  %v1417_v29 = vld [vmem:[#allocation2 + $0x500] sm:$0xff] }
0x11d8   :  { %v2223_v30 = vpop.eup %2222 }
0x11d9   :  { %v940_v54 = vadd.f32 1.0, %v2223_v30 }
0x11db   :  { %2224 = vrcp.f32 %v940_v54 }
0x11e5   :  { %v2225_v31 = vpop.eup %2224 }
0x11e6   :  { %v953_v38 = vsub.f32 1.0, %v2225_v31  ;;  %v961_v41 = vmul.f32 %v2225_v31, %v959_v40  ;;  %v1419_v40 = vld [vmem:[#allocation2 + $0x520] sm:$0xff] }
0x123c   :  { %v944_v33 = vpop.permute.xlu0 %943 }
0x123d   :  { %v946_v34 = vmul.f32 %v2225_v31, %v944_v33  ;;  %v2084_v31 = vpack.c.bf16 %v1308_v51, %v1307_v27  ;;  %v1401_v51 = vld [vmem:[#allocation2 + $0x400] sm:$0xff] }
0x123f   :  { %948 = vrot.lane.b32.xlu1 %v946_v34, %s2264_s0 }
0x12b1   :  { %v949_v35 = vpop.permute.xlu1 %948 }
0x12b2   :  { %v951_v36 = vadd.f32 %v949_v35, %v2344_v2  ;;  %v1309_v35 = vld [vmem:[#allocation2 + $0x320] sm:$0xff] }
0x12b4   :  { %2226 = vtanh.f32 %v951_v36  ;;  %v1310_v36 = vld [vmem:[#allocation2 + $0x330] sm:$0xff] }
0x12be   :  { %v2227_v37 = vpop.eup %2226 }
0x12bf   :  { %955 = vrot.lane.b32.xlu0 %v2227_v37, %s2265_s26 }
0x1331   :  { %v956_v4 = vpop.permute.xlu0 %955 }
0x1332   :  { %v958_v42 = vmul.f32 %v956_v4, %v953_v38  ;;  %v1420_v4 = vld [vmem:[#allocation2 + $0x530] sm:$0xff] }
0x1334   :  { %v2455_v43 = vadd.f32 %v961_v41, %v958_v42  ;;  %v2088_v42 = vpack.c.bf16 %v1310_v36, %v1309_v35  ;;  %v1407_v36 = vld [vmem:[#allocation2 + $0x460] sm:$0xff] }
0x1336   :  { %v964_v45 = vrot.slane %v2455_v43, 4  ;;  %v2463_v46 = vsel %vm1071_vm3, %v1075_v44, %v2455_v43  ;;  %v1065_v54 = vrot.slane %v2455_v43, 6  ;;  %v2120_v44 = vpack.c.bf16 %v1420_v4, %v1419_v40  ;;  %v1311_v43 = vld [vmem:[#allocation2 + $0x340] sm:$0xff]  ;;  %v1410_v4 = vld [vmem:[#allocation2 + $0x490] sm:$0xff] }
0x1337   :  { %v1409_v40 = vld [vmem:[#allocation2 + $0x480] sm:$0xff] }
0x1338   :  { %965 = vrot.lane.b32.xlu1 %v964_v45, %s2265_s26  ;;  %v1312_v45 = vld [vmem:[#allocation2 + $0x350] sm:$0xff] }
0x1339   :  { %v2092_v55 = vpack.c.bf16 %v1312_v45, %v1311_v43  ;;  %v1319_v45 = vld [vmem:[#allocation2 + $0x600] ss:$0 sm:$0xff] }
0x13aa   :  { %v966_v50 = vpop.permute.xlu1 %965 }
0x13ab   :  { %1841 = vmatmul.mubr.msk.f32.vlgmr.msra.gmra.mrb[14].mxu0 %vm48_vm0, %v966_v50 }
0x147e   :  { %v1035_v59 = vpop.f32.mrb[14].mxu0 }
0x147f   :  { %v1036_v63 = vadd.f32 %v1035_v59, %v2334_v58  ;;  %v1842_v23 = vpop.f32.mrb[15].mxu0  ;;  %v1314_v59 = vld [vmem:[#allocation2 + $0x370] sm:$0xff] }
0x1480   :  { %v2096_v23 = vpack.c.bf16 %v1314_v59, %v1313_v57  ;;  %v1579_v59 = vld [vmem:[#allocation2 + $0x610] ss:$0 sm:$0xff] }
0x1481   :  { %v1040_v61 = vrot.slane %v1036_v63, 2  ;;  %v1424_v63 = vld [vmem:[#allocation2 + $0x570] sm:$0xff] }
0x1483   :  { %1049 = vrot.lane.b32.xlu0 %v1040_v61, %s2264_s0  ;;  %v1042_v62 = vadd.f32 %v1040_v61, %v2344_v2  ;;  %v1315_v61 = vld [vmem:[#allocation2 + $0x380] sm:$0xff] }
0x1485   :  { %v1605_v1 = vmul.f32 -1.442695, %v1042_v62  ;;  %v1316_v62 = vld [vmem:[#allocation2 + $0x390] sm:$0xff] }
0x1487   :  { %2228 = vpow2.f32 %v1605_v1  ;;  %v1425_v1 = vld [vmem:[#allocation2 + $0x580] sm:$0xff] }
0x1491   :  { %v2229_v3 = vpop.eup %2228 }
0x1492   :  { %v1046_v5 = vadd.f32 1.0, %v2229_v3  ;;  %v1426_v3 = vld [vmem:[#allocation2 + $0x590] sm:$0xff] }
0x1493   :  { %v2132_v6 = vpack.c.bf16 %v1426_v3, %v1425_v1 }
0x1494   :  { %2230 = vrcp.f32 %v1046_v5  ;;  %v2100_v5 = vpack.c.bf16 %v1316_v62, %v1315_v61 }
0x149e   :  { %v2231_v58 = vpop.eup %2230 }
0x149f   :  { %v1059_v30 = vsub.f32 1.0, %v2231_v58  ;;  %v1067_v37 = vmul.f32 %v2231_v58, %v1065_v54  ;;  %v1404_v54 = vld [vmem:[#allocation2 + $0x430] sm:$0xff] }
0x14f5   :  { %v1050_v12 = vpop.permute.xlu0 %1049 }
0x14f6   :  { %v1052_v13 = vmul.f32 %v2231_v58, %v1050_v12  ;;  %v1288_v12 = vrot.slane %v1283_v7, %v40_v10 }
0x14f8   :  { %1054 = vrot.lane.b32.xlu1 %v1052_v13, %s2264_s0 }
0x14fc   :  { %1197 = vrot.lane.b32.xlu1 %v2402_v39, %s2265_s26  ;;  %v2108_v39 = vpack.c.bf16 %v1414_v20, %v1413_v18  ;;  %v1428_v18 = vld [vmem:[#allocation2 + $0x5b0] sm:$0xff] }
0x14fd   :  { %v2136_v48 = vpack.c.bf16 %v1428_v18, %v1427_v17  ;;  %v1398_v20 = vld [vmem:[#allocation2 + $0x3d0] sm:$0xff] }
0x14fe   :  { %2109 = vmatprep.subr.bf16.mxu0 %v2108_v39 }
0x14ff   :  { %2111 = vmatpush3.bf16.msra.mxu0 %v2108_v39  ;;  %v1399_v39 = vld [vmem:[#allocation2 + $0x3e0] sm:$0xff] }
0x156a   :  { %v1055_v25 = vpop.permute.xlu1 %1054 }
0x156b   :  { %v1057_v32 = vadd.f32 %v1055_v25, %v2344_v2  ;;  %v1416_v2 = vld [vmem:[#allocation2 + $0x4f0] sm:$0xff] }
0x156c   :  { %v2112_v28 = vpack.c.bf16 %v1416_v2, %v1415_v26 }
0x156d   :  { %2232 = vtanh.f32 %v1057_v32 }
0x156e   :  { %v1198_v14 = vpop.permute.xlu1 %1197  ;;  %2113 = vmatprep.subr.bf16.mxu0 %v2112_v28 }
0x156f   :  { %1606 = vmatmul.mubr.msk.f32.vlgmr.msra.gmra.mrb[6].mxu1 %vm48_vm0, %v1198_v14  ;;  %2115 = vmatpush3.bf16.msra.mxu0 %v2112_v28  ;;  %v1317_v14 = vld [vmem:[#allocation2 + $0x3a0] sm:$0xff] }
0x1570   :  { %1275 = vmatprep.mubr.f32.mxu1 %v2261_v0  ;;  %v1418_v0 = vld [vmem:[#allocation2 + $0x510] sm:$0xff]  ;;  %2079 = vmatpush3.bf16.msra.mxu1 %v2076_v19  ;;  %v1397_v19 = vld [vmem:[#allocation2 + $0x3c0] sm:$0xff] }
0x1571   :  { %2081 = vmatprep.subr.bf16.mxu1 %v2080_v49  ;;  %v2116_v34 = vpack.c.bf16 %v1418_v0, %v1417_v29  ;;  %v2140_v47 = vpack.c.bf16 %v1398_v20, %v1397_v19  ;;  %v1402_v29 = vld [vmem:[#allocation2 + $0x410] sm:$0xff] }
0x1572   :  { %v2148_v0 = vpack.c.bf16 %v1402_v29, %v1401_v51 }
0x1573   :  { %2117 = vmatprep.subr.bf16.mxu0 %v2116_v34 }
0x1574   :  { %2083 = vmatpush3.bf16.msra.mxu1 %v2080_v49  ;;  %2119 = vmatpush3.bf16.msra.mxu0 %v2116_v34  ;;  %v1400_v49 = vld [vmem:[#allocation2 + $0x3f0] sm:$0xff] }
0x1575   :  { %2085 = vmatprep.subr.bf16.mxu1 %v2084_v31  ;;  %2121 = vmatprep.subr.bf16.mxu0 %v2120_v44  ;;  %v2144_v28 = vpack.c.bf16 %v1400_v49, %v1399_v39  ;;  %v1406_v34 = vld [vmem:[#allocation2 + $0x450] sm:$0xff] }
0x1577   :  { %v2233_v15 = vpop.eup %2232 }
0x1578   :  { %1061 = vrot.lane.b32.xlu0 %v2233_v15, %s2265_s26  ;;  %2087 = vmatpush3.bf16.msra.mxu1 %v2084_v31  ;;  %v1318_v15 = vld [vmem:[#allocation2 + $0x3b0] sm:$0xff] }
0x1579   :  { %2089 = vmatprep.subr.bf16.mxu1 %v2088_v42  ;;  %2123 = vmatpush3.bf16.msra.mxu0 %v2120_v44  ;;  %v2104_v16 = vpack.c.bf16 %v1318_v15, %v1317_v14  ;;  %v1412_v44 = vld [vmem:[#allocation2 + $0x4b0] sm:$0xff] }
0x157a   :  { %2125 = vmatprep.subr.bf16.mxu0 %v2124_v56 }
0x157c   :  { %2091 = vmatpush3.bf16.msra.mxu1 %v2088_v42  ;;  %v1411_v42 = vld [vmem:[#allocation2 + $0x4a0] sm:$0xff] }
0x157d   :  { %2093 = vmatprep.subr.bf16.mxu1 %v2092_v55  ;;  %2127 = vmatpush3.bf16.msra.mxu0 %v2124_v56  ;;  %v2168_v43 = vpack.c.bf16 %v1412_v44, %v1411_v42 }
0x1580   :  { %2095 = vmatpush3.bf16.msra.mxu1 %v2092_v55 }
0x1581   :  { %2097 = vmatprep.subr.bf16.mxu1 %v2096_v23 }
0x1584   :  { %2099 = vmatpush3.bf16.msra.mxu1 %v2096_v23 }
0x1585   :  { %2101 = vmatprep.subr.bf16.mxu1 %v2100_v5 }
0x1588   :  { %2103 = vmatpush3.bf16.msra.mxu1 %v2100_v5 }
0x1589   :  { %2105 = vmatprep.subr.bf16.mxu1 %v2104_v16 }
0x158c   :  { %2107 = vmatpush3.bf16.msra.mxu1 %v2104_v16 }
0x15ea   :  { %v1062_v33 = vpop.permute.xlu0 %1061 }
0x15eb   :  { %v1064_v38 = vmul.f32 %v1062_v33, %v1059_v30  ;;  %v1403_v30 = vld [vmem:[#allocation2 + $0x420] sm:$0xff] }
0x15ec   :  { %v2152_v31 = vpack.c.bf16 %v1404_v54, %v1403_v30  ;;  %v1405_v33 = vld [vmem:[#allocation2 + $0x440] sm:$0xff] }
0x15ed   :  { %v1068_v41 = vadd.f32 %v1067_v37, %v1064_v38  ;;  %v2156_v35 = vpack.c.bf16 %v1406_v34, %v1405_v33  ;;  %v1408_v37 = vld [vmem:[#allocation2 + $0x470] sm:$0xff] }
0x15ee   :  { %v2160_v38 = vpack.c.bf16 %v1408_v37, %v1407_v36 }
0x15ef   :  { %v1077_v50 = vsel %vm1073_vm4, %v2463_v46, %v1068_v41  ;;  %v2128_v46 = vpack.c.bf16 %v1424_v63, %v1423_v60  ;;  %v2164_v41 = vpack.c.bf16 %v1410_v4, %v1409_v40 }
0x15f0   :  { %1199 = vrot.lane.b32.xlu0 %v1077_v50, %s2265_s26 }
0x15f1   :  { %2129 = vmatprep.subr.bf16.mxu0 %v2128_v46 }
0x15f2   :  { %2131 = vmatpush3.bf16.msra.mxu0 %v2128_v46 }
0x15f3   :  { %2133 = vmatprep.subr.bf16.mxu0 %v2132_v6 }
0x15f6   :  { %2135 = vmatpush3.bf16.msra.mxu0 %v2132_v6 }
0x15f7   :  { %2137 = vmatprep.subr.bf16.mxu0 %v2136_v48 }
0x15fa   :  { %2139 = vmatpush3.bf16.msra.mxu0 %v2136_v48 }
0x15fb   :  { %2141 = vmatprep.subr.bf16.mxu0 %v2140_v47 }
0x1642   :  { %v1271_v9 = vpop.f32.mrb[6].mxu1 }
0x1643   :  { %v1273_v24 = vpop.f32.mrb[7].mxu1  ;;  %v1295_v13 = vadd.f32 %v1288_v12, %v1271_v9 }
0x1644   :  { %v1296_v11 = vadd.f32 %v1292_v8, %v1273_v24 }
0x1645   :  { %v1299_v25 = vmax.f32 %v1295_v13, 0.0 }
0x1646   :  { %v1300_v58 = vmax.f32 %v1296_v11, 0.0 }
0x1648   :  { %1910 = vmatprep.mubr.f32.mxu0 %v1300_v58 }
0x1662   :  { %v1200_v32 = vpop.permute.xlu0 %1199 }
0x1663   :  { %1607 = vmatmul.mubr.msk.f32.gmra.mrb[8].mxu1 %vm48_vm0, %v1200_v32 }
0x1664   :  { %1875 = vmatprep.mubr.f32.mxu1 %v1299_v25 }
0x1736   :  { %v1277_v10 = vpop.f32.mrb[8].mxu1 }
0x1737   :  { %v1297_v21 = vadd.f32 %v1288_v12, %v1277_v10  ;;  %v1279_v22 = vpop.f32.mrb[9].mxu1 }
0x1738   :  { %v1298_v26 = vadd.f32 %v1292_v8, %v1279_v22 }
0x1739   :  { %v1301_v2 = vmax.f32 %v1297_v21, 0.0 }
0x173a   :  { %v1302_v27 = vmax.f32 %v1298_v26, 0.0 }
0x173b   :  { %1876 = vmatmul.mubr.f32.vlgmr.msra.gmra.mrb[10].mxu1 %v1301_v2 }
0x173c   :  { %1911 = vmatmul.mubr.f32.vlgmr.msra.gmra.mrb[16].mxu0 %v1302_v27 }
0x173d   :  { %2143 = vmatpush3.bf16.msra.mxu0 %v2140_v47 }
0x173e   :  { %2145 = vmatprep.subr.bf16.mxu0 %v2144_v28 }
0x1741   :  { %2147 = vmatpush3.bf16.msra.mxu0 %v2144_v28 }
0x1742   :  { %2149 = vmatprep.subr.bf16.mxu0 %v2148_v0 }
0x1745   :  { %2151 = vmatpush3.bf16.msra.mxu0 %v2148_v0 }
0x1746   :  { %2153 = vmatprep.subr.bf16.mxu0 %v2152_v31 }
0x1749   :  { %2155 = vmatpush3.bf16.msra.mxu0 %v2152_v31 }
0x174a   :  { %2157 = vmatprep.subr.bf16.mxu0 %v2156_v35 }
0x174d   :  { %2159 = vmatpush3.bf16.msra.mxu0 %v2156_v35 }
0x174e   :  { %2161 = vmatprep.subr.bf16.mxu0 %v2160_v38 }
0x1751   :  { %2163 = vmatpush3.bf16.msra.mxu0 %v2160_v38 }
0x1752   :  { %2165 = vmatprep.subr.bf16.mxu0 %v2164_v41 }
0x1755   :  { %2167 = vmatpush3.bf16.msra.mxu0 %v2164_v41 }
0x1756   :  { %2169 = vmatprep.subr.bf16.mxu0 %v2168_v43 }
0x1759   :  { %2171 = vmatpush3.bf16.msra.mxu0 %v2168_v43 }
0x180e   :  { %v1877_v50 = vpop.f32.mrb[10].mxu1 }
0x180f   :  { %v1392_v52 = vadd.f32 %v1877_v50, %v1319_v45  ;;  %v1386_v53 = vpop.f32.mrb[11].mxu1 }
0x1810   :  { %v1387_v55 = vadd.f32 %v1386_v53, %v1319_v45 }
0x1811   :  { %v1396_v57 = vmax.f32 %v1392_v52, 0.0 }
0x1812   :  { %v1395_v56 = vmax.f32 %v1387_v55, 0.0 }
0x1814   :  { %1945 = vmatprep.mubr.f32.mxu0 %v1395_v56 }
0x1815   :  { %1946 = vmatmul.mubr.f32.vlgmr.msra.gmra.mrb[16].mxu0 %v1396_v57 }
0x18e8   :  { %v1947_v60 = vpop.f32.mrb[16].mxu0 }
0x18e9   :  { %v1581_v63 = vadd.f32 %v1947_v60, %v1579_v59  ;;  %v1570_v23 = vpop.f32.mrb[17].mxu0 }
0x18ea   :  { %v1580_v46 = vadd.f32 %v1579_v59, %v1570_v23 }
0x18eb   :  { %1583 = vst [vmem:[%s2494_s2 + $0x8] sm:$0xff] %v1581_v63 }
0x18ec   :  { %1582 = vst [vmem:[%s2494_s2] sm:$0xff] %v1580_v46 }
0x18ed   :  { %1588 = vsyncpa [#allocation3], 1 }

</bundles_post_ra>
